<compile_context>
chip_gen: v7x
topology: tpu7x:2x2x1
jax: 0.10.0
libtpu: 0.0.40
codegen_flags: <defaults>
</compile_context>

<pallas_src>
import functools

import jax
import jax.numpy as jnp
from jax.experimental import pallas as pl
from jax.experimental.pallas import tpu as pltpu


def _fused_kernel(x_ref, w1t_ref, b1_ref, wse1t_ref, wse2t_ref, w2t_ref, b2_ref,
                  o_ref, acc_ref, w1g_ref, b1g_ref, *, hw, tile):
    """Fused SE-gated bin regressor.

    x_ref  : (1, C_in, T)          w1t : (mlp_dim, C_in)   b1 : (mlp_dim, 1)
    wse1t  : (red, mlp_dim)/HW     wse2t : (mlp_dim, red)
    w2t    : (n_bins, mlp_dim) f32 b2  : (n_bins, 1)
    o_ref  : (1, n_bins, T)  lane-dense output
    acc    : (mlp_dim, 1) f32      pooled-sum accumulator (scratch)
    w1g/b1g: gate-folded conv1 weight/bias (scratch, persist phase0 -> phase1)
    """
    p = pl.program_id(1)
    t = pl.program_id(2)
    n_t = pl.num_programs(2)
    last = n_t - 1

    # ---------------- phase 0: SE pooled sum + gate finalize ----------------
    @pl.when(p == 0)
    def _reduce_phase():
        @pl.when(t == 0)
        def _init():
            acc_ref[...] = jnp.zeros_like(acc_ref)

        # h_tile = ReLU((BN-folded conv1)(x_tile)), channels-first (mlp_dim, T).
        h = jnp.dot(w1t_ref[...], x_ref[0],
                    preferred_element_type=jnp.float32) + b1_ref[...]
        h = jnp.maximum(h, 0.0)

        if hw % tile != 0:
            valid = hw - last * tile   # static: columns valid in the last tile

            @pl.when(t == last)
            def _acc_masked():
                col = jax.lax.broadcasted_iota(jnp.int32, h.shape, 1)
                hm = jnp.where(col < valid, h, 0.0)
                acc_ref[...] += jnp.sum(hm, axis=1, keepdims=True)

            @pl.when(t != last)
            def _acc_full():
                acc_ref[...] += jnp.sum(h, axis=1, keepdims=True)
        else:
            acc_ref[...] += jnp.sum(h, axis=1, keepdims=True)

        @pl.when(t == last)
        def _finalize():
            # wse1t is pre-scaled by 1/HW, so the accumulated sum acts as the mean.
            z = jnp.maximum(
                jnp.dot(wse1t_ref[...], acc_ref[...],
                        preferred_element_type=jnp.float32), 0.0)
            gate = jax.nn.sigmoid(
                jnp.dot(wse2t_ref[...], z, preferred_element_type=jnp.float32))
            # Fold the (positive) gate into conv1: saves a full elementwise pass
            # over the (mlp_dim, T) intermediate in phase 1.
            w1g_ref[...] = (gate * w1t_ref[...].astype(jnp.float32)
                            ).astype(w1g_ref.dtype)
            b1g_ref[...] = gate * b1_ref[...]

    # ---------------- phase 1: gated conv1 -> conv2 -> softplus -------------
    @pl.when(p == 1)
    def _project_phase():
        h = jnp.dot(w1g_ref[...], x_ref[0],
                    preferred_element_type=jnp.float32) + b1g_ref[...]
        h = jnp.maximum(h, 0.0)                                    # (mlp_dim, T) f32
        o = jnp.dot(w2t_ref[...], h,
                    preferred_element_type=jnp.float32) + b2_ref[...]
        o_ref[0] = jax.nn.softplus(o).astype(o_ref.dtype)          # (n_bins, T)


def _pick_tile_hw(hw, c_in, mlp_dim, n_bins, in_bytes, out_bytes, budget):
    """Largest HW tile (multiple of 128, <= padded HW) fitting the VMEM budget."""
    hw_padded = pl.cdiv(hw, 128) * 128
    best = 128
    for t in (128, 256, 512, 1024, 2048, 4096, 8192):
        if t > hw_padded:
            break
        est = (2 * c_in * t * in_bytes        # double-buffered x tiles
               + 2 * n_bins * t * out_bytes   # double-buffered output tiles
               + 2 * mlp_dim * t * 4)         # f32 intermediates (h + headroom)
        if est <= budget:
            best = t
    return min(best, hw_padded)


def xcs_seed_bin_regressor(x_nchw, params, *, eps=1e-5, tile_hw=None,
                           matmul_dtype=jnp.bfloat16, out_dtype=jnp.float32,
                           vmem_budget_bytes=40 * 1024 * 1024):
    """Forward pass of XcsSeedBinRegressorUnnormed. Returns (B_centers, B_centers)."""
    B, C_in, H, W = x_nchw.shape
    HW = H * W
    mlp_dim = params["w1"].shape[1]
    n_bins = params["w2"].shape[1]
    f32 = jnp.float32

    in_bytes = jnp.dtype(matmul_dtype).itemsize
    out_bytes = jnp.dtype(out_dtype).itemsize
    T = tile_hw if tile_hw is not None else _pick_tile_hw(
        HW, C_in, mlp_dim, n_bins, in_bytes, out_bytes, vmem_budget_bytes)
    assert T % 128 == 0 or T == HW, "tile_hw must be a multiple of 128 (or H*W)"
    n_tiles = pl.cdiv(HW, T)

    # ---- Fold BatchNorm running stats into the 1x1-conv weights/biases. ----
    s1 = params["bn1_gamma"] / jnp.sqrt(params["bn1_var"] + eps)
    t1 = params["bn1_beta"] - params["bn1_mean"] * s1
    s2 = params["bn2_gamma"] / jnp.sqrt(params["bn2_var"] + eps)
    t2 = params["bn2_beta"] - params["bn2_mean"] * s2

    # Channels-first ("transposed") weights so pixels live on the lane axis.
    w1t = (params["w1"] * s1[None, :]).T.astype(matmul_dtype)      # (mlp_dim, C_in)
    b1c = (params["b1"] * s1 + t1).reshape(mlp_dim, 1).astype(f32)
    w2t = (params["w2"] * s2[None, :]).T.astype(f32)               # (n_bins, mlp_dim)
    b2c = (params["b2"] * s2 + t2).reshape(n_bins, 1).astype(f32)
    # SE weights stay f32 (tiny); fold 1/HW into the first SE matmul so the
    # kernel only accumulates a sum.
    wse1t = (params["wse1"].T / HW).astype(f32)                    # (red, mlp_dim)
    wse2t = params["wse2"].T.astype(f32)                           # (mlp_dim, red)

    # NCHW -> (B, C_in, HW): pure reshape, no transpose.
    x = x_nchw.reshape(B, C_in, HW).astype(matmul_dtype)

    def full2d(a):
        return pl.BlockSpec(a.shape, lambda b, p, t: (0, 0))

    kernel = functools.partial(_fused_kernel, hw=HW, tile=T)

    out = pl.pallas_call(
        kernel,
        out_shape=jax.ShapeDtypeStruct((B, n_bins, HW), out_dtype),
        grid=(B, 2, n_tiles),
        in_specs=[
            pl.BlockSpec((1, C_in, T), lambda b, p, t: (b, 0, t)),
            full2d(w1t), full2d(b1c), full2d(wse1t), full2d(wse2t),
            full2d(w2t), full2d(b2c),
        ],
        # Output block index is pinned to (b, 0, 0) during phase 0 (never written,
        # never flushed); phase 1 writes every tile lane-dense.
        out_specs=pl.BlockSpec((1, n_bins, T), lambda b, p, t: (b, 0, t * p)),
        scratch_shapes=[
            pltpu.VMEM((mlp_dim, 1), f32),              # SE pooled-sum accumulator
            pltpu.VMEM((mlp_dim, C_in), matmul_dtype),  # gate-folded conv1 weight
            pltpu.VMEM((mlp_dim, 1), f32),              # gate-folded conv1 bias
        ],
        compiler_params=pltpu.CompilerParams(
            dimension_semantics=("parallel", "arbitrary", "arbitrary"),
            vmem_limit_bytes=48 * 1024 * 1024),         # explicit; v7x VMEM = 64 MiB
    )(x, w1t, b1c, wse1t, wse2t, w2t, b2c)

    # (B, n_bins, HW) -> NCHW is a free reshape (no transpose).
    out_nchw = out.reshape(B, n_bins, H, W)
    return out_nchw, out_nchw


def _reference(x_nchw, params, eps=1e-5):
    """Plain-JAX reference (same math, no Pallas) for verification."""
    B, C_in, H, W = x_nchw.shape
    x = jnp.transpose(x_nchw, (0, 2, 3, 1)).reshape(B, H * W, C_in)
    s1 = params["bn1_gamma"] / jnp.sqrt(params["bn1_var"] + eps)
    t1 = params["bn1_beta"] - params["bn1_mean"] * s1
    s2 = params["bn2_gamma"] / jnp.sqrt(params["bn2_var"] + eps)
    t2 = params["bn2_beta"] - params["bn2_mean"] * s2

    h = x @ params["w1"] + params["b1"]
    h = jnp.maximum(h * s1 + t1, 0.0)
    y = jnp.mean(h, axis=1, keepdims=True)
    z = jnp.maximum(y @ params["wse1"], 0.0)
    gate = jax.nn.sigmoid(z @ params["wse2"])
    h = h * gate
    o = h @ params["w2"] + params["b2"]
    o = jax.nn.softplus(o * s2 + t2)
    n_bins = params["w2"].shape[1]
    return jnp.transpose(o.reshape(B, H, W, n_bins), (0, 3, 1, 2))


def _init_params(key, in_features, mlp_dim, n_bins, reduction=16):
    ks = jax.random.split(key, 12)
    f32 = jnp.float32
    return {
        # Conv2d(in_features, mlp_dim, 1) weight stored as (in, out)
        "w1": 0.1 * jax.random.normal(ks[0], (in_features, mlp_dim), f32),
        "b1": 0.1 * jax.random.normal(ks[1], (mlp_dim,), f32),
        "bn1_gamma": 1.0 + 0.1 * jax.random.normal(ks[2], (mlp_dim,), f32),
        "bn1_beta": 0.1 * jax.random.normal(ks[3], (mlp_dim,), f32),
        "bn1_mean": 0.1 * jax.random.normal(ks[4], (mlp_dim,), f32),
        "bn1_var": jax.random.uniform(ks[5], (mlp_dim,), f32, 0.5, 1.5),
        # SE: Linear(mlp_dim, mlp_dim//reduction, bias=False) then back
        "wse1": 0.1 * jax.random.normal(ks[6], (mlp_dim, mlp_dim // reduction), f32),
        "wse2": 0.1 * jax.random.normal(ks[7], (mlp_dim // reduction, mlp_dim), f32),
        # Conv2d(mlp_dim, n_bins, 1)
        "w2": 0.1 * jax.random.normal(ks[8], (mlp_dim, n_bins), f32),
        "b2": 0.1 * jax.random.normal(ks[9], (n_bins,), f32),
        "bn2_gamma": 1.0 + 0.1 * jax.random.normal(ks[10], (n_bins,), f32),
        "bn2_beta": 0.1 * jax.random.normal(ks[11], (n_bins,), f32),
        "bn2_mean": jnp.zeros((n_bins,), f32),
        "bn2_var": jnp.ones((n_bins,), f32),
    }


if __name__ == "__main__":
    B, C_in, H, W = 2, 4, 16, 16
    mlp_dim, n_bins = 256, 16

    key = jax.random.PRNGKey(0)
    k_x, k_p = jax.random.split(key)
    x = jax.random.normal(k_x, (B, C_in, H, W), jnp.float32)
    params = _init_params(k_p, C_in, mlp_dim, n_bins)

    # tile_hw=128 -> grid (B, 2, 2) so the tiled SE reduction path is exercised.
    fwd_f32 = jax.jit(functools.partial(
        xcs_seed_bin_regressor, tile_hw=128, matmul_dtype=jnp.float32))
    fwd_bf16 = jax.jit(functools.partial(
        xcs_seed_bin_regressor, matmul_dtype=jnp.bfloat16))   # auto tile (=256)

    o32, _ = fwd_f32(x, params)
    o16, _ = fwd_bf16(x, params)
    jax.block_until_ready((o32, o16))

    ref = _reference(x, params)
    assert o32.shape == (B, n_bins, H, W)
    # f32 matmul path: BN/gate folding are exact up to f32 reassociation rounding.
    assert jnp.allclose(o32, ref, atol=5e-4, rtol=5e-4)
    # bf16 input/conv1 fast path: f32 accumulation, looser tolerance.
    assert o16.shape == (B, n_bins, H, W)
    assert jnp.allclose(o16, ref, atol=3e-2, rtol=3e-2)

    # Non-divisible HW (H=W=15 -> HW=225, T=128): exercises the masked partial tile.
    x_odd = jax.random.normal(jax.random.PRNGKey(1), (B, C_in, 15, 15), jnp.float32)
    fwd_odd = jax.jit(functools.partial(
        xcs_seed_bin_regressor, tile_hw=128, matmul_dtype=jnp.float32))
    o_odd, _ = fwd_odd(x_odd, params)
    jax.block_until_ready(o_odd)
    ref_odd = _reference(x_odd, params)
    assert jnp.allclose(o_odd, ref_odd, atol=5e-4, rtol=5e-4)

    print("KERNEL_OK")
</pallas_src>

<mosaic_0001>
module attributes {stable_mosaic.version = 11 : i64} {
  func.func @_fused_kernel(%arg0: i32, %arg1: i32, %arg2: i32, %arg3: memref<1x4x128xf32, #tpu.memory_space<vmem>>, %arg4: memref<256x4xf32, #tpu.memory_space<vmem>>, %arg5: memref<256x1xf32, #tpu.memory_space<vmem>>, %arg6: memref<16x256xf32, #tpu.memory_space<vmem>>, %arg7: memref<256x16xf32, #tpu.memory_space<vmem>>, %arg8: memref<16x256xf32, #tpu.memory_space<vmem>>, %arg9: memref<16x1xf32, #tpu.memory_space<vmem>>, %arg10: memref<1x16x128xf32, #tpu.memory_space<vmem>>, %arg11: memref<256x1xf32, #tpu.memory_space<vmem>>, %arg12: memref<256x4xf32, #tpu.memory_space<vmem>>, %arg13: memref<256x1xf32, #tpu.memory_space<vmem>>) attributes {dimension_semantics = [#tpu.dimension_semantics<parallel>, #tpu.dimension_semantics<arbitrary>, #tpu.dimension_semantics<arbitrary>], iteration_bounds = array<i64: 2, 2, 2>, scalar_prefetch = 0 : i64, scratch_operands = 3 : i64, tpu.core_type = #tpu.core_type<tc>, window_params = [{transform_indices = @transform_0, window_bounds = array<i64: 1, 4, 128>}, {pipeline_mode = #tpu.pipeline_mode<synchronous>, transform_indices = @transform_1, window_bounds = array<i64: 256, 4>}, {pipeline_mode = #tpu.pipeline_mode<synchronous>, transform_indices = @transform_2, window_bounds = array<i64: 256, 1>}, {pipeline_mode = #tpu.pipeline_mode<synchronous>, transform_indices = @transform_3, window_bounds = array<i64: 16, 256>}, {pipeline_mode = #tpu.pipeline_mode<synchronous>, transform_indices = @transform_4, window_bounds = array<i64: 256, 16>}, {pipeline_mode = #tpu.pipeline_mode<synchronous>, transform_indices = @transform_5, window_bounds = array<i64: 16, 256>}, {pipeline_mode = #tpu.pipeline_mode<synchronous>, transform_indices = @transform_6, window_bounds = array<i64: 16, 1>}, {transform_indices = @transform_7, window_bounds = array<i64: 1, 16, 128>}]} {
    %c0_i32 = arith.constant 0 : i32
    %0 = arith.cmpi eq, %arg1, %c0_i32 : i32
    %1 = arith.extui %0 : i1 to i32
    %c0_i32_0 = arith.constant 0 : i32
    %2 = arith.cmpi ne, %1, %c0_i32_0 : i32
    scf.if %2 {
      %c0_i32_2 = arith.constant 0 : i32
      %6 = arith.cmpi eq, %arg2, %c0_i32_2 : i32
      %7 = arith.extui %6 : i1 to i32
      %c0_i32_3 = arith.constant 0 : i32
      %8 = arith.cmpi ne, %7, %c0_i32_3 : i32
      scf.if %8 {
        %cst_18 = arith.constant 0.000000e+00 : f32
        %26 = vector.broadcast %cst_18 : f32 to vector<256x1xf32>
        %c0_19 = arith.constant 0 : index
        %c0_20 = arith.constant 0 : index
        %27 = vector.load %arg11[%c0_19, %c0_20] : memref<256x1xf32, #tpu.memory_space<vmem>>, vector<256x1xf32>
        tpu.vector_store %arg11[%c0_19, %c0_20], %26 {strides = array<i32>} : memref<256x1xf32, #tpu.memory_space<vmem>>, vector<256x1xf32>,
      } else {
      }
      %c0 = arith.constant 0 : index
      %c0_4 = arith.constant 0 : index
      %9 = vector.load %arg4[%c0, %c0_4] : memref<256x4xf32, #tpu.memory_space<vmem>>, vector<256x4xf32>
      %c0_5 = arith.constant 0 : index
      %c0_6 = arith.constant 0 : index
      %c0_7 = arith.constant 0 : index
      %10 = vector.load %arg3[%c0_5, %c0_6, %c0_7] : memref<1x4x128xf32, #tpu.memory_space<vmem>>, vector<1x4x128xf32>
      %11 = vector.shape_cast %10 : vector<1x4x128xf32> to vector<4x128xf32>
      %cst = arith.constant dense<0.000000e+00> : vector<256x128xf32>
      %12 = tpu.matmul %9, %11, %cst {dimension_numbers = #tpu.dot_dimension_numbers<[1], [0], [0], [1], [0, 0, 1, 1], [], []>} : vector<256x4xf32>, vector<4x128xf32>, vector<256x128xf32> -> vector<256x128xf32>
      %c0_8 = arith.constant 0 : index
      %c0_9 = arith.constant 0 : index
      %13 = vector.load %arg5[%c0_8, %c0_9] : memref<256x1xf32, #tpu.memory_space<vmem>>, vector<256x1xf32>
      %14 = vector.broadcast %13 : vector<256x1xf32> to vector<256x128xf32>
      %15 = arith.addf %12, %14 : vector<256x128xf32>
      %cst_10 = arith.constant 0.000000e+00 : f32
      %16 = vector.broadcast %cst_10 : f32 to vector<256x128xf32>
      %17 = arith.maximumf %15, %16 : vector<256x128xf32>
      %c0_11 = arith.constant 0 : index
      %c0_12 = arith.constant 0 : index
      %18 = vector.load %arg11[%c0_11, %c0_12] : memref<256x1xf32, #tpu.memory_space<vmem>>, vector<256x1xf32>
      %cst_13 = arith.constant dense<0.000000e+00> : vector<256xf32>
      %19 = vector.multi_reduction <add>, %17, %cst_13 [1] : vector<256x128xf32> to vector<256xf32>
      %20 = vector.shape_cast %19 : vector<256xf32> to vector<256x1xf32>
      %21 = arith.addf %18, %20 : vector<256x1xf32>
      %c0_14 = arith.constant 0 : index
      %c0_15 = arith.constant 0 : index
      %22 = vector.load %arg11[%c0_14, %c0_15] : memref<256x1xf32, #tpu.memory_space<vmem>>, vector<256x1xf32>
      tpu.vector_store %arg11[%c0_14, %c0_15], %21 {strides = array<i32>} : memref<256x1xf32, #tpu.memory_space<vmem>>, vector<256x1xf32>,
      %c1_i32_16 = arith.constant 1 : i32
      %23 = arith.cmpi eq, %arg2, %c1_i32_16 : i32
      %24 = arith.extui %23 : i1 to i32
      %c0_i32_17 = arith.constant 0 : i32
      %25 = arith.cmpi ne, %24, %c0_i32_17 : i32
      scf.if %25 {
        %c0_18 = arith.constant 0 : index
        %c0_19 = arith.constant 0 : index
        %26 = vector.load %arg6[%c0_18, %c0_19] : memref<16x256xf32, #tpu.memory_space<vmem>>, vector<16x256xf32>
        %c0_20 = arith.constant 0 : index
        %c0_21 = arith.constant 0 : index
        %27 = vector.load %arg11[%c0_20, %c0_21] : memref<256x1xf32, #tpu.memory_space<vmem>>, vector<256x1xf32>
        %cst_22 = arith.constant dense<0.000000e+00> : vector<16x1xf32>
        %28 = tpu.matmul %26, %27, %cst_22 {dimension_numbers = #tpu.dot_dimension_numbers<[1], [0], [0], [1], [0, 0, 1, 1], [], []>} : vector<16x256xf32>, vector<256x1xf32>, vector<16x1xf32> -> vector<16x1xf32>
        %cst_23 = arith.constant 0.000000e+00 : f32
        %29 = vector.broadcast %cst_23 : f32 to vector<16x1xf32>
        %30 = arith.maximumf %28, %29 : vector<16x1xf32>
        %c0_24 = arith.constant 0 : index
        %c0_25 = arith.constant 0 : index
        %31 = vector.load %arg7[%c0_24, %c0_25] : memref<256x16xf32, #tpu.memory_space<vmem>>, vector<256x16xf32>
        %cst_26 = arith.constant dense<0.000000e+00> : vector<256x1xf32>
        %32 = tpu.matmul %31, %30, %cst_26 {dimension_numbers = #tpu.dot_dimension_numbers<[1], [0], [0], [1], [0, 0, 1, 1], [], []>} : vector<256x16xf32>, vector<16x1xf32>, vector<256x1xf32> -> vector<256x1xf32>
        %33 = arith.negf %32 : vector<256x1xf32>
        %34 = math.exp %33 : vector<256x1xf32>
        %cst_27 = arith.constant 1.000000e+00 : f32
        %35 = vector.broadcast %cst_27 : f32 to vector<256x1xf32>
        %36 = arith.addf %35, %34 : vector<256x1xf32>
        %37 = arith.divf %35, %36 : vector<256x1xf32>
        %c0_28 = arith.constant 0 : index
        %c0_29 = arith.constant 0 : index
        %38 = vector.load %arg4[%c0_28, %c0_29] : memref<256x4xf32, #tpu.memory_space<vmem>>, vector<256x4xf32>
        %39 = vector.broadcast %37 : vector<256x1xf32> to vector<256x4xf32>
        %40 = arith.mulf %39, %38 : vector<256x4xf32>
        %c0_30 = arith.constant 0 : index
        %c0_31 = arith.constant 0 : index
        %41 = vector.load %arg12[%c0_30, %c0_31] : memref<256x4xf32, #tpu.memory_space<vmem>>, vector<256x4xf32>
        tpu.vector_store %arg12[%c0_30, %c0_31], %40 {strides = array<i32>} : memref<256x4xf32, #tpu.memory_space<vmem>>, vector<256x4xf32>,
        %c0_32 = arith.constant 0 : index
        %c0_33 = arith.constant 0 : index
        %42 = vector.load %arg5[%c0_32, %c0_33] : memref<256x1xf32, #tpu.memory_space<vmem>>, vector<256x1xf32>
        %43 = arith.mulf %37, %42 : vector<256x1xf32>
        %c0_34 = arith.constant 0 : index
        %c0_35 = arith.constant 0 : index
        %44 = vector.load %arg13[%c0_34, %c0_35] : memref<256x1xf32, #tpu.memory_space<vmem>>, vector<256x1xf32>
        tpu.vector_store %arg13[%c0_34, %c0_35], %43 {strides = array<i32>} : memref<256x1xf32, #tpu.memory_space<vmem>>, vector<256x1xf32>,
      } else {
      }
    } else {
    }
    %c1_i32 = arith.constant 1 : i32
    %3 = arith.cmpi eq, %arg1, %c1_i32 : i32
    %4 = arith.extui %3 : i1 to i32
    %c0_i32_1 = arith.constant 0 : i32
    %5 = arith.cmpi ne, %4, %c0_i32_1 : i32
    scf.if %5 {
      %c0 = arith.constant 0 : index
      %c0_2 = arith.constant 0 : index
      %6 = vector.load %arg12[%c0, %c0_2] : memref<256x4xf32, #tpu.memory_space<vmem>>, vector<256x4xf32>
      %c0_3 = arith.constant 0 : index
      %c0_4 = arith.constant 0 : index
      %c0_5 = arith.constant 0 : index
      %7 = vector.load %arg3[%c0_3, %c0_4, %c0_5] : memref<1x4x128xf32, #tpu.memory_space<vmem>>, vector<1x4x128xf32>
      %8 = vector.shape_cast %7 : vector<1x4x128xf32> to vector<4x128xf32>
      %cst = arith.constant dense<0.000000e+00> : vector<256x128xf32>
      %9 = tpu.matmul %6, %8, %cst {dimension_numbers = #tpu.dot_dimension_numbers<[1], [0], [0], [1], [0, 0, 1, 1], [], []>} : vector<256x4xf32>, vector<4x128xf32>, vector<256x128xf32> -> vector<256x128xf32>
      %c0_6 = arith.constant 0 : index
      %c0_7 = arith.constant 0 : index
      %10 = vector.load %arg13[%c0_6, %c0_7] : memref<256x1xf32, #tpu.memory_space<vmem>>, vector<256x1xf32>
      %11 = vector.broadcast %10 : vector<256x1xf32> to vector<256x128xf32>
      %12 = arith.addf %9, %11 : vector<256x128xf32>
      %cst_8 = arith.constant 0.000000e+00 : f32
      %13 = vector.broadcast %cst_8 : f32 to vector<256x128xf32>
      %14 = arith.maximumf %12, %13 : vector<256x128xf32>
      %c0_9 = arith.constant 0 : index
      %c0_10 = arith.constant 0 : index
      %15 = vector.load %arg8[%c0_9, %c0_10] : memref<16x256xf32, #tpu.memory_space<vmem>>, vector<16x256xf32>
      %cst_11 = arith.constant dense<0.000000e+00> : vector<16x128xf32>
      %16 = tpu.matmul %15, %14, %cst_11 {dimension_numbers = #tpu.dot_dimension_numbers<[1], [0], [0], [1], [0, 0, 1, 1], [], []>} : vector<16x256xf32>, vector<256x128xf32>, vector<16x128xf32> -> vector<16x128xf32>
      %c0_12 = arith.constant 0 : index
      %c0_13 = arith.constant 0 : index
      %17 = vector.load %arg9[%c0_12, %c0_13] : memref<16x1xf32, #tpu.memory_space<vmem>>, vector<16x1xf32>
      %18 = vector.broadcast %17 : vector<16x1xf32> to vector<16x128xf32>
      %19 = arith.addf %16, %18 : vector<16x128xf32>
      %cst_14 = arith.constant 0.000000e+00 : f32
      %20 = vector.broadcast %cst_14 : f32 to vector<16x128xf32>
      %21 = arith.maximumf %19, %20 : vector<16x128xf32>
      %22 = vector.broadcast %cst_14 : f32 to vector<16x128xf32>
      %23 = arith.subf %19, %22 : vector<16x128xf32>
      %24 = arith.cmpf one, %23, %23 : vector<16x128xf32>
      %25 = vector.broadcast %cst_14 : f32 to vector<16x128xf32>
      %26 = arith.addf %19, %25 : vector<16x128xf32>
      %27 = math.absf %23 : vector<16x128xf32>
      %cst_15 = arith.constant 0.000000e+00 : f32
      %28 = vector.broadcast %cst_15 : f32 to vector<16x128xf32>
      %29 = arith.subf %28, %27 : vector<16x128xf32>
      %30 = math.exp %29 : vector<16x128xf32>
      %31 = math.log1p %30 : vector<16x128xf32>
      %32 = arith.addf %21, %31 : vector<16x128xf32>
      %33 = arith.select %24, %26, %32 : vector<16x128xi1>, vector<16x128xf32>
      %c0_16 = arith.constant 0 : index
      %c0_17 = arith.constant 0 : index
      %c0_18 = arith.constant 0 : index
      %34 = vector.load %arg10[%c0_16, %c0_17, %c0_18] : memref<1x16x128xf32, #tpu.memory_space<vmem>>, vector<1x16x128xf32>
      %35 = vector.shape_cast %34 : vector<1x16x128xf32> to vector<16x128xf32>
      %36 = vector.shape_cast %33 : vector<16x128xf32> to vector<1x16x128xf32>
      tpu.vector_store %arg10[%c0_16, %c0_17, %c0_18], %36 {strides = array<i32>} : memref<1x16x128xf32, #tpu.memory_space<vmem>>, vector<1x16x128xf32>,
    } else {
    }
    return
  }
  func.func @transform_0(%arg0: i32, %arg1: i32, %arg2: i32) -> (i32, i32, i32) {
    %c0_i32 = arith.constant 0 : i32
    %c0_i32_0 = arith.constant 0 : i32
    return %arg0, %c0_i32, %arg2 : i32, i32, i32
  }
  func.func @transform_1(%arg0: i32, %arg1: i32, %arg2: i32) -> (i32, i32) {
    %c0_i32 = arith.constant 0 : i32
    %c0_i32_0 = arith.constant 0 : i32
    %c0_i32_1 = arith.constant 0 : i32
    return %c0_i32, %c0_i32_0 : i32, i32
  }
  func.func @transform_2(%arg0: i32, %arg1: i32, %arg2: i32) -> (i32, i32) {
    %c0_i32 = arith.constant 0 : i32
    %c0_i32_0 = arith.constant 0 : i32
    %c0_i32_1 = arith.constant 0 : i32
    return %c0_i32, %c0_i32_0 : i32, i32
  }
  func.func @transform_3(%arg0: i32, %arg1: i32, %arg2: i32) -> (i32, i32) {
    %c0_i32 = arith.constant 0 : i32
    %c0_i32_0 = arith.constant 0 : i32
    %c0_i32_1 = arith.constant 0 : i32
    return %c0_i32, %c0_i32_0 : i32, i32
  }
  func.func @transform_4(%arg0: i32, %arg1: i32, %arg2: i32) -> (i32, i32) {
    %c0_i32 = arith.constant 0 : i32
    %c0_i32_0 = arith.constant 0 : i32
    %c0_i32_1 = arith.constant 0 : i32
    return %c0_i32, %c0_i32_0 : i32, i32
  }
  func.func @transform_5(%arg0: i32, %arg1: i32, %arg2: i32) -> (i32, i32) {
    %c0_i32 = arith.constant 0 : i32
    %c0_i32_0 = arith.constant 0 : i32
    %c0_i32_1 = arith.constant 0 : i32
    return %c0_i32, %c0_i32_0 : i32, i32
  }
  func.func @transform_6(%arg0: i32, %arg1: i32, %arg2: i32) -> (i32, i32) {
    %c0_i32 = arith.constant 0 : i32
    %c0_i32_0 = arith.constant 0 : i32
    %c0_i32_1 = arith.constant 0 : i32
    return %c0_i32, %c0_i32_0 : i32, i32
  }
  func.func @transform_7(%arg0: i32, %arg1: i32, %arg2: i32) -> (i32, i32, i32) {
    %0 = arith.muli %arg2, %arg1 : i32
    %c0_i32 = arith.constant 0 : i32
    %c0_i32_0 = arith.constant 0 : i32
    return %arg0, %c0_i32, %0 : i32, i32, i32
  }
}

</mosaic_0001>

<bundles_post_ra>
// kernel: xcs_seed_bin_regressor.1
= control target key start
LH: loop header
LB: loop body
LE: loop exit
PB: predicated region body
PF: predicated region fallthrough
CT: control target
= control target key end

     0   :  { %s3829_s24 = smov 0   ;;  %s3831_s25 = smov 0   ;;  %s4804_s0 = inlined_call_operand.vmem [shape: f32[2,4,256], index: 0, kind: input, shape index: {}]   ;;  %s4805_s1 = inlined_call_operand.vmem [shape: f32[256,4], index: 1, kind: input, shape index: {}]   ;;  %s4806_s2 = inlined_call_operand.vmem [shape: f32[256,1], index: 2, kind: input, shape index: {}]   ;;  %s4807_s3 = inlined_call_operand.vmem [shape: f32[16,256], index: 3, kind: input, shape index: {}]   ;;  %s4808_s4 = inlined_call_operand.vmem [shape: f32[256,16], index: 4, kind: input, shape index: {}]   ;;  %s4809_s5 = inlined_call_operand.vmem [shape: f32[16,256], index: 5, kind: input, shape index: {}]   ;;  %s4810_s6 = inlined_call_operand.vmem [shape: f32[16,1], index: 6, kind: input, shape index: {}]   ;;  %s4811_s7 = inlined_call_operand.vmem [shape: f32[2,16,256], index: 7, kind: output, shape index: {}]  }
   0x1   :  { %s3833_s26 = smov 0   ;;  %s3835_s27 = smov 0  }
   0x2   :  { %s3837_s28 = smov 0   ;;  %s3839_s29 = smov 0  }
   0x3   :  { %s3841_s30 = smov 0   ;;  %s3843_s8 = smov 0  }
   0x4   :  { %s3845_s9 = smov 0  }
   0x5 LB: > { %s29_s10 = sadd.s32 1, %s3771_s29  ;;  %s32_s11 = sadd.s32 1, %s3775_s30  ;;  %s3783_s9 = sphi %s3845_s9, %s17_s9   ;;  %s3779_s8 = sphi %s3843_s8, %s4826_s8   ;;  %s3775_s30 = sphi %s3841_s30, %s4825_s30   ;;  %s3771_s29 = sphi %s3839_s29, %s4824_s29   ;;  %s3767_s28 = sphi %s3837_s28, %s4823_s28   ;;  %s3763_s27 = sphi %s3835_s27, %s4822_s27   ;;  %s3759_s26 = sphi %s3833_s26, %s4821_s26   ;;  %s3755_s25 = sphi %s3831_s25, %s4820_s25   ;;  %s3751_s24 = sphi %s3829_s24, %s4819_s24  }
   0x6   : > { %p30_p0 = scmp.ge.s32.totalorder %s29_s10, 2  ;;  %s2948_s12 = sadd.s32 4294967295, %s3783_s9  }
   0x7   : > { %s36_s13 = sadd.s32 1, %s3779_s8  ;;  %s194_s14 = smul.u32 %s3771_s29, %s3775_s30 }
   0x8   : > { %s4828_s10 = smov (%p30_p0, %s29_s10), 0  ;;  %s4830_s11 = smov (!%p30_p0, %s32_s11), %s3775_s30 }
   0x9   : > { %p211_p1 = scmp.ne.s32.totalorder %s3755_s25, %s3751_s24  ;;  %p34_p2 = scmp.ge.s32.totalorder %s4830_s11, 2 }
   0xa   : > { %p212_p3 = scmp.eq.s32.totalorder %s2948_s12, 7  ;;  %p2952_p4 = scmp.ge.s32.totalorder %s3783_s9, 1 }
   0xb   : > { %p265_p5 = scmp.lt.s32.totalorder %s3783_s9, 9  ;;  %s4832_s11 = smov (%p34_p2, %s4830_s11), 0 }
   0xc   : > { %4814 = sst [smem:[#allocation6_spill]] %s4832_s11  ;;  %s4834_s13 = smov (!%p34_p2, %s36_s13), %s3779_s8 }
   0xd   : > { %s195_s15 = smul.u32 %s4832_s11, %s4828_s10  ;;  %p3892_p6 = por %p212_p3, %p211_p1 }
   0xe   : > { %p38_p7 = scmp.ge.s32.totalorder %s4834_s13, 2  ;;  %p266_p8 = pnand %p2952_p4, %p265_p5 }
   0xf   : > { %s197_s17 = ssub.s32 %s194_s14, %s195_s15  ;;  %s201_s20 = sadd.s32 1, %s3755_s25 }
  0x10   : > { %s4836_s13 = smov (%p38_p7, %s4834_s13), 0  ;;  %269 = sbr.rel (%p266_p8) target bundleno = 1703 (0x6a7), region = 48 }
  0x11   : > { %4816 = sst [smem:[#allocation7_spill]] %s4836_s13  ;;  %s196_s18 = ssub.s32 %s3779_s8, %s4836_s13 }
  0x12   : > { %s198_s19 = sor.u32 %s197_s17, %s196_s18  ;;  %s296_s22 = sand.u32 (!%p266_p8), 1, %s3751_s24  }
  0x13   : > { %p199_p9 = scmp.eq.s32.totalorder %s198_s19, 0  ;;  %p299_p10 = scmp.lt.s32.totalorder (!%p266_p8), %s3767_s28, 1 }
  0x14   : > { %s2953_s23 = sshll.u32 (!%p266_p8), %s296_s22, 4  ;;  %p301_p11 = scmp.lt.s32.totalorder (!%p266_p8), %s3759_s26, 1 }
  0x15   : > { %s3902_s21 = scalar_select %p199_p9, %s3755_s25, %s201_s20  }
  0x16   : > { %s3914_s20 = scalar_lea.vmem (!%p266_p8), [#allocation5], %s2953_s23  ;;  %p2956_p12 = scmp.ne.s32.totalorder (!%p266_p8), %s3763_s27, 0 }
  0x17   : > { %s300_s12 = scalar_select %p299_p10, %s3767_s28, 1 }
  0x18   : > { %s302_s14 = scalar_select %p301_p11, %s3759_s26, 1 }
  0x19   : > { %s2954_s15 = sshll.u32 %s300_s12, 1  ;;  %311 = sbr.rel (%p2956_p12) target bundleno = 1150 (0x47e), region = 52 }
  0x1a   : > { %s304_s11 = sadd.s32 %s2954_s15, %s302_s14  ;;  %p2957_p13 = scmp.ne.s32.totalorder (!%p2956_p12), %s3759_s26, 0 }
  0x1b   : > { %s2955_s13 = sshll.u32 %s304_s11, 2 }
  0x1c   : > { %s3912_s19 = scalar_lea.vmem %s4804_s0, %s2955_s13 }
  0x20   : > { %315 = sbr.rel (%p2957_p13) target bundleno = 49 (0x31), region = 56  ;;  %vm316_vm0 = vcmask (!%p2957_p13), 7168   ;;  %v3785_v0 = vmov (!%p2957_p13), 0.0  }
  0x21   : > { %317 = vst.msk [vmem:[#allocation2] sm:$0xff] (!%p2957_p13), %vm316_vm0, %v3785_v0  ;;  %318 = vst.msk [vmem:[#allocation2 + $0x8] sm:$0xff] (!%p2957_p13), %vm316_vm0, %v3785_v0 }
  0x22   : > { %319 = vst.msk [vmem:[#allocation2 + $0x10] sm:$0xff] (!%p2957_p13), %vm316_vm0, %v3785_v0  ;;  %320 = vst.msk [vmem:[#allocation2 + $0x18] sm:$0xff] (!%p2957_p13), %vm316_vm0, %v3785_v0 }
  0x23   : > { %321 = vst.msk [vmem:[#allocation2 + $0x20] sm:$0xff] (!%p2957_p13), %vm316_vm0, %v3785_v0  ;;  %322 = vst.msk [vmem:[#allocation2 + $0x28] sm:$0xff] (!%p2957_p13), %vm316_vm0, %v3785_v0 }
  0x24   : > { %323 = vst.msk [vmem:[#allocation2 + $0x30] sm:$0xff] (!%p2957_p13), %vm316_vm0, %v3785_v0  ;;  %324 = vst.msk [vmem:[#allocation2 + $0x38] sm:$0xff] (!%p2957_p13), %vm316_vm0, %v3785_v0 }
  0x25   : > { %325 = vst.msk [vmem:[#allocation2 + $0x40] sm:$0xff] (!%p2957_p13), %vm316_vm0, %v3785_v0  ;;  %326 = vst.msk [vmem:[#allocation2 + $0x48] sm:$0xff] (!%p2957_p13), %vm316_vm0, %v3785_v0 }
  0x26   : > { %327 = vst.msk [vmem:[#allocation2 + $0x50] sm:$0xff] (!%p2957_p13), %vm316_vm0, %v3785_v0  ;;  %328 = vst.msk [vmem:[#allocation2 + $0x58] sm:$0xff] (!%p2957_p13), %vm316_vm0, %v3785_v0 }
  0x27   : > { %329 = vst.msk [vmem:[#allocation2 + $0x60] sm:$0xff] %vm316_vm0, %v3785_v0  ;;  %330 = vst.msk [vmem:[#allocation2 + $0x68] sm:$0xff] %vm316_vm0, %v3785_v0 }
  0x28   : > { %331 = vst.msk [vmem:[#allocation2 + $0x70] sm:$0xff] %vm316_vm0, %v3785_v0  ;;  %332 = vst.msk [vmem:[#allocation2 + $0x78] sm:$0xff] %vm316_vm0, %v3785_v0 }
  0x29   : > { %333 = vst.msk [vmem:[#allocation2 + $0x80] sm:$0xff] %vm316_vm0, %v3785_v0  ;;  %334 = vst.msk [vmem:[#allocation2 + $0x88] sm:$0xff] %vm316_vm0, %v3785_v0 }
  0x2a   : > { %335 = vst.msk [vmem:[#allocation2 + $0x90] sm:$0xff] %vm316_vm0, %v3785_v0  ;;  %336 = vst.msk [vmem:[#allocation2 + $0x98] sm:$0xff] %vm316_vm0, %v3785_v0 }
  0x2b   : > { %337 = vst.msk [vmem:[#allocation2 + $0xa0] sm:$0xff] %vm316_vm0, %v3785_v0  ;;  %338 = vst.msk [vmem:[#allocation2 + $0xa8] sm:$0xff] %vm316_vm0, %v3785_v0 }
  0x2c   : > { %339 = vst.msk [vmem:[#allocation2 + $0xb0] sm:$0xff] %vm316_vm0, %v3785_v0  ;;  %340 = vst.msk [vmem:[#allocation2 + $0xb8] sm:$0xff] %vm316_vm0, %v3785_v0 }
  0x2d   : > { %341 = vst.msk [vmem:[#allocation2 + $0xc0] sm:$0xff] %vm316_vm0, %v3785_v0  ;;  %342 = vst.msk [vmem:[#allocation2 + $0xc8] sm:$0xff] %vm316_vm0, %v3785_v0 }
  0x2e   : > { %343 = vst.msk [vmem:[#allocation2 + $0xd0] sm:$0xff] %vm316_vm0, %v3785_v0  ;;  %344 = vst.msk [vmem:[#allocation2 + $0xd8] sm:$0xff] %vm316_vm0, %v3785_v0 }
  0x2f   : > { %345 = vst.msk [vmem:[#allocation2 + $0xe0] sm:$0xff] %vm316_vm0, %v3785_v0  ;;  %346 = vst.msk [vmem:[#allocation2 + $0xe8] sm:$0xff] %vm316_vm0, %v3785_v0 }
  0x30   : > { %347 = vst.msk [vmem:[#allocation2 + $0xf0] sm:$0xff] %vm316_vm0, %v3785_v0  ;;  %348 = vst.msk [vmem:[#allocation2 + $0xf8] sm:$0xff] %vm316_vm0, %v3785_v0 }
  0x31 PF: > { %v381_v1 = vld [vmem:[%s3912_s19] sm:$0xf]  ;;  %vm671_vm1 = vcmask 1043456   ;;  %v384_v2 = vld [vmem:[%s4806_s2 + $0x10] sm:$0xff]  ;;  %v3786_v3 = vmov 0   ;;  %vm574_vm2 = vcmask 31744  }
  0x32   : > { %3572 = vset.pattern.permute.xlu1 %v3786_v3  ;;  %3271 = vmatprep.subr.msk.mxu0 %vm671_vm1, %v381_v1  ;;  %v349_v4 = vld [vmem:[%s4805_s1] sm:$0xff]  ;;  %v350_v6 = vld [vmem:[%s4805_s1 + $0x8] sm:$0xff]  ;;  %v385_v8 = vld [vmem:[%s4806_s2 + $0x18] sm:$0xff]  ;;  %vm1060_vm3 = vcmask 7168   ;;  %p2991_p0 = scmp.ne.s32.totalorder %s3759_s26, 1 }
  0x33   : > { %v365_v5 = vld [vmem:[%s4805_s1 + $0x80] sm:$0xff]  ;;  %3491 = vmatprep.subr.msk.mxu1 %vm671_vm1, %v381_v1  ;;  %426 = vperm.xlu1 %3572, %v384_v2   ;;  %v366_v7 = vld [vmem:[%s4805_s1 + $0x88] sm:$0xff]  ;;  %v351_v9 = vld [vmem:[%s4805_s1 + $0x10] sm:$0xff]  ;;  %vm1242_vm4 = vcmask (!%p2991_p0), 130048  }
  0x34   : > { %3272 = vmatpush3.msk.msra.mxu0 %vm671_vm1, %v381_v1  ;;  %3492 = vmatpush3.msk.msra.mxu1 %vm671_vm1, %v381_v1  ;;  %v367_v10 = vld [vmem:[%s4805_s1 + $0x90] sm:$0xff]  ;;  %v382_v11 = vld [vmem:[%s4806_s2] sm:$0xff]  ;;  %v352_v12 = vld [vmem:[%s4805_s1 + $0x18] sm:$0xff] }
  0x35   : > { %3273 = vmatprep.mubr.msk.f32.mxu0 %vm574_vm2, %v349_v4  ;;  %3297 = vmatprep.mubr.msk.f32.mxu1 %vm574_vm2, %v365_v5  ;;  %v368_v13 = vld [vmem:[%s4805_s1 + $0x98] sm:$0xff]  ;;  %v387_v14 = vld [vmem:[%s4806_s2 + $0x28] sm:$0xff]  ;;  %v353_v15 = vld [vmem:[%s4805_s1 + $0x20] sm:$0xff] }
  0x36   : > { %3274 = vmatmul.mubr.msk.f32.vlgmr.msra.gmra.mrb[0].mxu0 %vm574_vm2, %v350_v6  ;;  %3298 = vmatmul.mubr.msk.f32.vlgmr.msra.gmra.mrb[0].mxu1 %vm574_vm2, %v366_v7  ;;  %v369_v16 = vld [vmem:[%s4805_s1 + $0xa0] sm:$0xff]  ;;  %v383_v17 = vld [vmem:[%s4806_s2 + $0x8] sm:$0xff]  ;;  %v389_v20 = vld [vmem:[%s4806_s2 + $0x38] sm:$0xff] }
  0x37   : > { %3571 = vset.pattern.permute.xlu0 %v3786_v3  ;;  %431 = vperm.xlu1 %3572, %v385_v8   ;;  %v354_v18 = vld [vmem:[%s4805_s1 + $0x28] sm:$0xff]  ;;  %v355_v21 = vld [vmem:[%s4805_s1 + $0x30] sm:$0xff]  ;;  %v386_v23 = vld [vmem:[%s4806_s2 + $0x20] sm:$0xff] }
  0x38   : > { %3276 = vmatprep.mubr.msk.f32.mxu0 %vm574_vm2, %v351_v9  ;;  %3300 = vmatprep.mubr.msk.f32.mxu1 %vm574_vm2, %v367_v10  ;;  %v370_v19 = vld [vmem:[%s4805_s1 + $0xa8] sm:$0xff]  ;;  %v371_v22 = vld [vmem:[%s4805_s1 + $0xb0] sm:$0xff]  ;;  %v356_v24 = vld [vmem:[%s4805_s1 + $0x38] sm:$0xff] }
  0x39   : > { %416 = vperm.xlu0 %3571, %v382_v11   ;;  %v372_v25 = vld [vmem:[%s4805_s1 + $0xb8] sm:$0xff]  ;;  %v391_v26 = vld [vmem:[%s4806_s2 + $0x48] sm:$0xff]  ;;  %v357_v27 = vld [vmem:[%s4805_s1 + $0x40] sm:$0xff] }
  0x3a   : > { %3277 = vmatmul.mubr.msk.f32.gmra.mrb[2].mxu0 %vm574_vm2, %v352_v12  ;;  %3301 = vmatmul.mubr.msk.f32.gmra.mrb[2].mxu1 %vm574_vm2, %v368_v13  ;;  %v373_v28 = vld [vmem:[%s4805_s1 + $0xc0] sm:$0xff]  ;;  %v388_v29 = vld [vmem:[%s4806_s2 + $0x30] sm:$0xff]  ;;  %v358_v30 = vld [vmem:[%s4805_s1 + $0x48] sm:$0xff] }
  0x3b   : > { %441 = vperm.xlu1 %3572, %v387_v14   ;;  %3279 = vmatprep.mubr.msk.f32.mxu0 %vm574_vm2, %v353_v15  ;;  %v374_v31 = vld [vmem:[%s4805_s1 + $0xc8] sm:$0xff]  ;;  %v393_v32 = vld [vmem:[%s4806_s2 + $0x58] sm:$0xff]  ;;  %v359_v33 = vld [vmem:[%s4805_s1 + $0x50] sm:$0xff] }
  0x3c   : > { %3303 = vmatprep.mubr.msk.f32.mxu1 %vm574_vm2, %v369_v16  ;;  %v375_v34 = vld [vmem:[%s4805_s1 + $0xd0] sm:$0xff]  ;;  %v390_v35 = vld [vmem:[%s4806_s2 + $0x40] sm:$0xff]  ;;  %v360_v36 = vld [vmem:[%s4805_s1 + $0x58] sm:$0xff] }
  0x3d   : > { %421 = vperm.xlu0 %3571, %v383_v17   ;;  %v376_v37 = vld [vmem:[%s4805_s1 + $0xd8] sm:$0xff]  ;;  %v395_v38 = vld [vmem:[%s4806_s2 + $0x68] sm:$0xff]  ;;  %v361_v39 = vld [vmem:[%s4805_s1 + $0x60] sm:$0xff] }
  0x3e   : > { %3280 = vmatmul.mubr.msk.f32.gmra.mrb[4].mxu0 %vm574_vm2, %v354_v18  ;;  %3304 = vmatmul.mubr.msk.f32.gmra.mrb[4].mxu1 %vm574_vm2, %v370_v19  ;;  %v377_v40 = vld [vmem:[%s4805_s1 + $0xe0] sm:$0xff]  ;;  %v392_v41 = vld [vmem:[%s4806_s2 + $0x50] sm:$0xff]  ;;  %v362_v42 = vld [vmem:[%s4805_s1 + $0x68] sm:$0xff] }
  0x3f   : > { %451 = vperm.xlu1 %3572, %v389_v20   ;;  %3282 = vmatprep.mubr.msk.f32.mxu0 %vm574_vm2, %v355_v21  ;;  %v378_v43 = vld [vmem:[%s4805_s1 + $0xe8] sm:$0xff]  ;;  %v397_v44 = vld [vmem:[%s4806_s2 + $0x78] sm:$0xff]  ;;  %v363_v45 = vld [vmem:[%s4805_s1 + $0x70] sm:$0xff] }
  0x40   : > { %3306 = vmatprep.mubr.msk.f32.mxu1 %vm574_vm2, %v371_v22  ;;  %v379_v46 = vld [vmem:[%s4805_s1 + $0xf0] sm:$0xff]  ;;  %v394_v47 = vld [vmem:[%s4806_s2 + $0x60] sm:$0xff]  ;;  %v364_v48 = vld [vmem:[%s4805_s1 + $0x78] sm:$0xff] }
  0x41   : > { %436 = vperm.xlu0 %3571, %v386_v23   ;;  %v380_v49 = vld [vmem:[%s4805_s1 + $0xf8] sm:$0xff]  ;;  %v399_v50 = vld [vmem:[%s4806_s2 + $0x88] sm:$0xff]  ;;  %v396_v51 = vld [vmem:[%s4806_s2 + $0x70] sm:$0xff] }
  0x42   : > { %3283 = vmatmul.mubr.msk.f32.gmra.mrb[6].mxu0 %vm574_vm2, %v356_v24  ;;  %3307 = vmatmul.mubr.msk.f32.gmra.mrb[6].mxu1 %vm574_vm2, %v372_v25  ;;  %v401_v52 = vld [vmem:[%s4806_s2 + $0x98] sm:$0xff]  ;;  %v398_v53 = vld [vmem:[%s4806_s2 + $0x80] sm:$0xff]  ;;  %v403_v54 = vld [vmem:[%s4806_s2 + $0xa8] sm:$0xff] }
  0x43   : > { %461 = vperm.xlu1 %3572, %v391_v26   ;;  %3285 = vmatprep.mubr.msk.f32.mxu0 %vm574_vm2, %v357_v27  ;;  %v400_v55 = vld [vmem:[%s4806_s2 + $0x90] sm:$0xff]  ;;  %v405_v56 = vld [vmem:[%s4806_s2 + $0xb8] sm:$0xff]  ;;  %v402_v57 = vld [vmem:[%s4806_s2 + $0xa0] sm:$0xff] }
  0x44   : > { %3309 = vmatprep.mubr.msk.f32.mxu1 %vm574_vm2, %v373_v28  ;;  %v407_v58 = vld [vmem:[%s4806_s2 + $0xc8] sm:$0xff]  ;;  %v404_v59 = vld [vmem:[%s4806_s2 + $0xb0] sm:$0xff]  ;;  %v409_v60 = vld [vmem:[%s4806_s2 + $0xd8] sm:$0xff] }
  0x45   : > { %446 = vperm.xlu0 %3571, %v388_v29   ;;  %v406_v61 = vld [vmem:[%s4806_s2 + $0xc0] sm:$0xff]  ;;  %v411_v62 = vld [vmem:[%s4806_s2 + $0xe8] sm:$0xff]  ;;  %v408_v63 = vld [vmem:[%s4806_s2 + $0xd0] sm:$0xff] }
  0x46   : > { %3286 = vmatmul.mubr.msk.f32.gmra.mrb[8].mxu0 %vm574_vm2, %v358_v30  ;;  %3310 = vmatmul.mubr.msk.f32.gmra.mrb[8].mxu1 %vm574_vm2, %v374_v31  ;;  %v413_v0 = vld [vmem:[%s4806_s2 + $0xf8] sm:$0xff]  ;;  %v410_v1 = vld [vmem:[%s4806_s2 + $0xe0] sm:$0xff]  ;;  %v412_v2 = vld [vmem:[%s4806_s2 + $0xf0] sm:$0xff] }
  0x47   : > { %471 = vperm.xlu1 %3572, %v393_v32   ;;  %3288 = vmatprep.mubr.msk.f32.mxu0 %vm574_vm2, %v359_v33 }
  0x48   : > { %3312 = vmatprep.mubr.msk.f32.mxu1 %vm574_vm2, %v375_v34 }
  0x49   : > { %456 = vperm.xlu0 %3571, %v390_v35  }
  0x4a   : > { %3289 = vmatmul.mubr.msk.f32.gmra.mrb[10].mxu0 %vm574_vm2, %v360_v36  ;;  %3313 = vmatmul.mubr.msk.f32.gmra.mrb[10].mxu1 %vm574_vm2, %v376_v37 }
  0x4b   : > { %481 = vperm.xlu1 %3572, %v395_v38   ;;  %3291 = vmatprep.mubr.msk.f32.mxu0 %vm574_vm2, %v361_v39 }
  0x4c   : > { %3315 = vmatprep.mubr.msk.f32.mxu1 %vm574_vm2, %v377_v40 }
  0x4d   : > { %466 = vperm.xlu0 %3571, %v392_v41  }
  0x4e   : > { %3292 = vmatmul.mubr.msk.f32.gmra.mrb[12].mxu0 %vm574_vm2, %v362_v42  ;;  %3316 = vmatmul.mubr.msk.f32.gmra.mrb[12].mxu1 %vm574_vm2, %v378_v43 }
  0x4f   : > { %491 = vperm.xlu1 %3572, %v397_v44   ;;  %3294 = vmatprep.mubr.msk.f32.mxu0 %vm574_vm2, %v363_v45 }
  0x50   : > { %3318 = vmatprep.mubr.msk.f32.mxu1 %vm574_vm2, %v379_v46 }
  0x51   : > { %476 = vperm.xlu0 %3571, %v394_v47  }
  0x52   : > { %3295 = vmatmul.mubr.msk.f32.gmra.mrb[14].mxu0 %vm574_vm2, %v364_v48  ;;  %3319 = vmatmul.mubr.msk.f32.gmra.mrb[14].mxu1 %vm574_vm2, %v380_v49 }
  0x53   : > { %501 = vperm.xlu1 %3572, %v399_v50  }
  0x55   : > { %486 = vperm.xlu0 %3571, %v396_v51  }
  0x57   : > { %511 = vperm.xlu1 %3572, %v401_v52  }
  0x59   : > { %496 = vperm.xlu0 %3571, %v398_v53  }
  0x5b   : > { %521 = vperm.xlu1 %3572, %v403_v54  }
  0x5d   : > { %506 = vperm.xlu0 %3571, %v400_v55  }
  0x5f   : > { %531 = vperm.xlu1 %3572, %v405_v56  }
  0x61   : > { %516 = vperm.xlu0 %3571, %v402_v57  }
  0x63   : > { %541 = vperm.xlu1 %3572, %v407_v58  }
  0x65   : > { %526 = vperm.xlu0 %3571, %v404_v59  }
  0x67   : > { %551 = vperm.xlu1 %3572, %v409_v60  }
  0x69   : > { %536 = vperm.xlu0 %3571, %v406_v61  }
  0x6b   : > { %561 = vperm.xlu1 %3572, %v411_v62  }
  0x6d   : > { %546 = vperm.xlu0 %3571, %v408_v63  }
  0x6f   : > { %571 = vperm.xlu1 %3572, %v413_v0  }
  0x71   : > { %556 = vperm.xlu0 %3571, %v410_v1  }
  0x75   : > { %566 = vperm.xlu0 %3571, %v412_v2  }
  0xb2   : > { %v427_v3 = vpop.permute.xlu1 %426 }
  0xb6   : > { %v432_v5 = vpop.permute.xlu1 %431 }
  0xb8   : > { %v417_v4 = vpop.permute.xlu0 %416 }
  0xba   : > { %v4175_v7 = vpop.permute.xlu1 %441 }
  0xbc   : > { %v422_v6 = vpop.permute.xlu0 %421 }
  0xbe   : > { %v4177_v9 = vpop.permute.xlu1 %451 }
  0xc0   : > { %v437_v8 = vpop.permute.xlu0 %436 }
  0xc2   : > { %v4181_v11 = vpop.permute.xlu1 %461 }
  0xc4   : > { %v4179_v10 = vpop.permute.xlu0 %446 }
  0xc6   : > { %v4185_v13 = vpop.permute.xlu1 %471 }
  0xc8   : > { %v4183_v12 = vpop.permute.xlu0 %456 }
  0xca   : > { %v4189_v15 = vpop.permute.xlu1 %481 }
  0xcc   : > { %v4187_v14 = vpop.permute.xlu0 %466 }
  0xce   : > { %v4193_v17 = vpop.permute.xlu1 %491 }
  0xd0   : > { %v4191_v16 = vpop.permute.xlu0 %476 }
  0xd2   : > { %v502_v19 = vpop.permute.xlu1 %501 }
  0xd4   : > { %v4195_v18 = vpop.permute.xlu0 %486 }
  0xd6   : > { %v512_v44 = vpop.permute.xlu1 %511 }
  0xd8   : > { %v497_v20 = vpop.permute.xlu0 %496 }
  0xdc   : > { %v507_v35 = vpop.permute.xlu0 %506 }
  0xe0   : > { %v517_v53 = vpop.permute.xlu0 %516 }
 0x109   : > { %v3275_v21 = vpop.f32.mrb[0].mxu0  ;;  %v3299_v22 = vpop.f32.mrb[0].mxu1 }
 0x10a   : > { %v747_v23 = vadd.f32 %v3275_v21, %v422_v6  ;;  %v827_v24 = vadd.f32 %v3299_v22, %v502_v19  ;;  %v741_v25 = vpop.f32.mrb[1].mxu0  ;;  %v821_v26 = vpop.f32.mrb[1].mxu1 }
 0x10b   : > { %v742_v29 = vadd.f32 %v741_v25, %v417_v4  ;;  %v822_v30 = vadd.f32 %v821_v26, %v497_v20 }
 0x10c   : > { %v901_v27 = vmax.f32 %v747_v23, 0.0  ;;  %v917_v28 = vmax.f32 %v827_v24, 0.0 }
 0x10d   : > { %v3278_v31 = vpop.f32.mrb[2].mxu0  ;;  %v3302_v32 = vpop.f32.mrb[2].mxu1  ;;  %v900_v36 = vmax.f32 %v742_v29, 0.0  ;;  %v916_v37 = vmax.f32 %v822_v30, 0.0 }
 0x10e   : > { %998 = vadd.xlane.f32.xlu0 %v917_v28  ;;  %v831_v33 = vpop.f32.mrb[3].mxu1  ;;  %966 = vadd.xlane.f32.xlu1 %v901_v27  ;;  %v751_v34 = vpop.f32.mrb[3].mxu0  ;;  %v757_v38 = vadd.f32 %v3278_v31, %v432_v5  ;;  %v837_v46 = vadd.f32 %v3302_v32, %v512_v44 }
 0x10f   : > { %v832_v39 = vadd.f32 %v831_v33, %v507_v35  ;;  %v752_v55 = vadd.f32 %v751_v34, %v427_v3  ;;  %v522_v3 = vpop.permute.xlu1 %521 }
 0x110   : > { %v903_v45 = vmax.f32 %v757_v38, 0.0  ;;  %v919_v54 = vmax.f32 %v837_v46, 0.0 }
 0x111   : > { %v3281_v40 = vpop.f32.mrb[4].mxu0  ;;  %v3305_v41 = vpop.f32.mrb[4].mxu1  ;;  %v918_v47 = vmax.f32 %v832_v39, 0.0  ;;  %v902_v62 = vmax.f32 %v752_v55, 0.0 }
 0x112   : > { %v841_v42 = vpop.f32.mrb[5].mxu1  ;;  %996 = vadd.xlane.f32.xlu1 %v916_v37  ;;  %v761_v43 = vpop.f32.mrb[5].mxu0  ;;  %964 = vadd.xlane.f32.xlu0 %v900_v36  ;;  %v767_v63 = vadd.f32 %v3281_v40, %v4175_v7  ;;  %v847_v20 = vadd.f32 %v3305_v41, %v522_v3 }
 0x113   : > { %v762_v48 = vadd.f32 %v761_v43, %v437_v8  ;;  %v842_v56 = vadd.f32 %v841_v42, %v517_v53  ;;  %v527_v8 = vpop.permute.xlu0 %526  ;;  %v532_v34 = vpop.permute.xlu1 %531 }
 0x114   : > { %v905_v19 = vmax.f32 %v767_v63, 0.0  ;;  %v921_v7 = vmax.f32 %v847_v20, 0.0  ;;  %v948_v20 = vld [vmem:[#allocation2 + $0x80] sm:$0xff] }
 0x115   : > { %v3284_v49 = vpop.f32.mrb[6].mxu0  ;;  %v3308_v50 = vpop.f32.mrb[6].mxu1  ;;  %v904_v57 = vmax.f32 %v762_v48, 0.0  ;;  %v920_v0 = vmax.f32 %v842_v56, 0.0 }
 0x116   : > { %v851_v51 = vpop.f32.mrb[7].mxu1  ;;  %1000 = vadd.xlane.f32.xlu1 %v918_v47  ;;  %v771_v52 = vpop.f32.mrb[7].mxu0  ;;  %970 = vadd.xlane.f32.xlu0 %v903_v45  ;;  %v857_v37 = vadd.f32 %v3308_v50, %v532_v34 }
 0x117   : > { %v772_v1 = vadd.f32 %v771_v52, %v4179_v10  ;;  %v852_v21 = vadd.f32 %v851_v51, %v527_v8  ;;  %v777_v10 = vadd.f32 %v3284_v49, %v4177_v9  ;;  %v537_v35 = vpop.permute.xlu0 %536 }
 0x118   : > { %v923_v9 = vmax.f32 %v857_v37, 0.0  ;;  %v934_v37 = vld [vmem:[#allocation2 + $0x10] sm:$0xff] }
 0x119   : > { %v3287_v58 = vpop.f32.mrb[8].mxu0  ;;  %v3311_v59 = vpop.f32.mrb[8].mxu1  ;;  %v906_v22 = vmax.f32 %v772_v1, 0.0  ;;  %v922_v27 = vmax.f32 %v852_v21, 0.0  ;;  %v907_v36 = vmax.f32 %v777_v10, 0.0  ;;  %v932_v21 = vld [vmem:[#allocation2] sm:$0xff] }
 0x11a   : > { %v781_v60 = vpop.f32.mrb[9].mxu0  ;;  %v861_v61 = vpop.f32.mrb[9].mxu1  ;;  %972 = vadd.xlane.f32.xlu1 %v904_v57  ;;  %1002 = vadd.xlane.f32.xlu0 %v919_v54  ;;  %v787_v40 = vadd.f32 %v3287_v58, %v4181_v11 }
 0x11b   : > { %v782_v28 = vadd.f32 %v781_v60, %v4183_v12  ;;  %v862_v39 = vadd.f32 %v861_v61, %v537_v35  ;;  %v547_v42 = vpop.permute.xlu0 %546 }
 0x11c   : > { %v909_v43 = vmax.f32 %v787_v40, 0.0 }
 0x11d   : > { %v3290_v2 = vpop.f32.mrb[10].mxu0  ;;  %v3314_v4 = vpop.f32.mrb[10].mxu1  ;;  %v908_v38 = vmax.f32 %v782_v28, 0.0  ;;  %v924_v12 = vmax.f32 %v862_v39, 0.0 }
 0x11e   : > { %v791_v5 = vpop.f32.mrb[11].mxu0  ;;  %v871_v6 = vpop.f32.mrb[11].mxu1  ;;  %1004 = vadd.xlane.f32.xlu1 %v920_v0  ;;  %968 = vadd.xlane.f32.xlu0 %v902_v62  ;;  %v797_v48 = vadd.f32 %v3290_v2, %v4185_v13 }
 0x11f   : > { %v792_v41 = vadd.f32 %v791_v5, %v4187_v14  ;;  %v872_v46 = vadd.f32 %v871_v6, %v547_v42  ;;  %v557_v14 = vpop.permute.xlu0 %556  ;;  %v933_v5 = vld [vmem:[#allocation2 + $0x8] sm:$0xff] }
 0x120   : > { %v911_v51 = vmax.f32 %v797_v48, 0.0 }
 0x121   : > { %v3293_v23 = vpop.f32.mrb[12].mxu0  ;;  %v3317_v24 = vpop.f32.mrb[12].mxu1  ;;  %v910_v45 = vmax.f32 %v792_v41, 0.0  ;;  %v926_v49 = vmax.f32 %v872_v46, 0.0  ;;  %v937_v41 = vld [vmem:[#allocation2 + $0x28] sm:$0xff] }
 0x122   : > { %v801_v25 = vpop.f32.mrb[13].mxu0  ;;  %v881_v26 = vpop.f32.mrb[13].mxu1  ;;  %976 = vadd.xlane.f32.xlu1 %v906_v22  ;;  %974 = vadd.xlane.f32.xlu0 %v905_v19  ;;  %v807_v56 = vadd.f32 %v3293_v23, %v4189_v15  ;;  %v953_v46 = vld [vmem:[#allocation2 + $0xa8] sm:$0xff] }
 0x123   : > { %v802_v50 = vadd.f32 %v801_v25, %v4191_v16  ;;  %v882_v54 = vadd.f32 %v881_v26, %v557_v14  ;;  %v567_v16 = vpop.permute.xlu0 %566  ;;  %v950_v26 = vld [vmem:[#allocation2 + $0x90] sm:$0xff]  ;;  %v939_v14 = vld [vmem:[#allocation2 + $0x38] sm:$0xff] }
 0x125   : > { %v3296_v29 = vpop.f32.mrb[14].mxu0  ;;  %v3320_v30 = vpop.f32.mrb[14].mxu1  ;;  %v912_v53 = vmax.f32 %v802_v50, 0.0  ;;  %v928_v57 = vmax.f32 %v882_v54, 0.0 }
 0x126   : > { %v817_v31 = vadd.f32 %v3296_v29, %v4193_v17  ;;  %v811_v32 = vpop.f32.mrb[15].mxu0  ;;  %v891_v33 = vpop.f32.mrb[15].mxu1  ;;  %1008 = vadd.xlane.f32.xlu1 %v922_v27  ;;  %1006 = vadd.xlane.f32.xlu0 %v921_v7  ;;  %v935_v7 = vld [vmem:[#allocation2 + $0x18] sm:$0xff] }
 0x127   : > { %v542_v17 = vpop.permute.xlu1 %541  ;;  %v812_v58 = vadd.f32 %v811_v32, %v4195_v18  ;;  %v892_v62 = vadd.f32 %v891_v33, %v567_v16  ;;  %v949_v18 = vld [vmem:[#allocation2 + $0x88] sm:$0xff] }
 0x128   : > { %v867_v44 = vadd.f32 %v3311_v59, %v542_v17  ;;  %v913_v59 = vmax.f32 %v807_v56, 0.0  ;;  %v915_v2 = vmax.f32 %v817_v31, 0.0  ;;  %v951_v31 = vld [vmem:[#allocation2 + $0x98] sm:$0xff] }
 0x129   : > { %v914_v61 = vmax.f32 %v812_v58, 0.0  ;;  %v930_v0 = vmax.f32 %v892_v62, 0.0  ;;  %v955_v56 = vld [vmem:[#allocation2 + $0xb8] sm:$0xff] }
 0x12a   : > { %980 = vadd.xlane.f32.xlu1 %v908_v38  ;;  %978 = vadd.xlane.f32.xlu0 %v907_v36  ;;  %v925_v47 = vmax.f32 %v867_v44, 0.0  ;;  %v952_v36 = vld [vmem:[#allocation2 + $0xa0] sm:$0xff] }
 0x12b   : > { %v552_v11 = vpop.permute.xlu1 %551 }
 0x12c   : > { %v877_v52 = vadd.f32 %v3314_v4, %v552_v11  ;;  %v940_v11 = vld [vmem:[#allocation2 + $0x40] sm:$0xff] }
 0x12e   : > { %1012 = vadd.xlane.f32.xlu1 %v924_v12  ;;  %1010 = vadd.xlane.f32.xlu0 %v923_v9  ;;  %v927_v55 = vmax.f32 %v877_v52, 0.0  ;;  %v938_v12 = vld [vmem:[#allocation2 + $0x30] sm:$0xff] }
 0x12f   : > { %v562_v13 = vpop.permute.xlu1 %561 }
 0x130   : > { %v887_v60 = vadd.f32 %v3317_v24, %v562_v13 }
 0x132   : > { %984 = vadd.xlane.f32.xlu1 %v910_v45  ;;  %982 = vadd.xlane.f32.xlu0 %v909_v43  ;;  %v929_v63 = vmax.f32 %v887_v60, 0.0  ;;  %v954_v45 = vld [vmem:[#allocation2 + $0xb0] sm:$0xff]  ;;  %v941_v60 = vld [vmem:[#allocation2 + $0x48] sm:$0xff] }
 0x133   : > { %v572_v1 = vpop.permute.xlu1 %571 }
 0x134   : > { %v897_v15 = vadd.f32 %v3320_v30, %v572_v1  ;;  %v936_v30 = vld [vmem:[#allocation2 + $0x20] sm:$0xff]  ;;  %v958_v1 = vld [vmem:[#allocation2 + $0xd0] sm:$0xff] }
 0x136   : > { %1016 = vadd.xlane.f32.xlu1 %v926_v49  ;;  %1014 = vadd.xlane.f32.xlu0 %v925_v47  ;;  %v931_v4 = vmax.f32 %v897_v15, 0.0 }
 0x13a   : > { %988 = vadd.xlane.f32.xlu1 %v912_v53  ;;  %986 = vadd.xlane.f32.xlu0 %v911_v51 }
 0x13e   : > { %1020 = vadd.xlane.f32.xlu1 %v928_v57  ;;  %1018 = vadd.xlane.f32.xlu0 %v927_v55  ;;  %v956_v55 = vld [vmem:[#allocation2 + $0xc0] sm:$0xff] }
 0x142   : > { %992 = vadd.xlane.f32.xlu1 %v914_v61  ;;  %990 = vadd.xlane.f32.xlu0 %v913_v59  ;;  %v942_v59 = vld [vmem:[#allocation2 + $0x50] sm:$0xff] }
 0x146   : > { %1024 = vadd.xlane.f32.xlu1 %v930_v0  ;;  %1022 = vadd.xlane.f32.xlu0 %v929_v63 }
 0x14a   : > { %994 = vadd.xlane.f32.xlu0 %v915_v2  ;;  %v957_v2 = vld [vmem:[#allocation2 + $0xc8] sm:$0xff] }
 0x14e   : > { %1026 = vadd.xlane.f32.xlu0 %v931_v4 }
 0x19b   : > { %v999_v6 = vpop.xlane.xlu0 %998  ;;  %v967_v3 = vpop.xlane.xlu1 %966 }
 0x19c   : > { %v1045_v8 = vadd.f32 %v999_v6, %v949_v18  ;;  %v1029_v19 = vadd.f32 %v967_v3, %v933_v5  ;;  %v944_v6 = vld [vmem:[#allocation2 + $0x60] sm:$0xff]  ;;  %v943_v3 = vld [vmem:[#allocation2 + $0x58] sm:$0xff] }
 0x19e   : > { %1078 = vst.msk [vmem:[#allocation2 + $0x88] sm:$0xff] %vm1060_vm3, %v1045_v8  ;;  %1062 = vst.msk [vmem:[#allocation2 + $0x8] sm:$0xff] %vm1060_vm3, %v1029_v19 }
 0x19f   : > { %v997_v22 = vpop.xlane.xlu1 %996  ;;  %v965_v23 = vpop.xlane.xlu0 %964 }
 0x1a0   : > { %v1044_v24 = vadd.f32 %v997_v22, %v948_v20  ;;  %v1028_v25 = vadd.f32 %v965_v23, %v932_v21  ;;  %v960_v22 = vld [vmem:[#allocation2 + $0xe0] sm:$0xff]  ;;  %v959_v23 = vld [vmem:[#allocation2 + $0xd8] sm:$0xff] }
 0x1a2   : > { %1077 = vst.msk [vmem:[#allocation2 + $0x80] sm:$0xff] %vm1060_vm3, %v1044_v24  ;;  %1061 = vst.msk [vmem:[#allocation2] sm:$0xff] %vm1060_vm3, %v1028_v25 }
 0x1a3   : > { %v1001_v10 = vpop.xlane.xlu1 %1000  ;;  %v971_v27 = vpop.xlane.xlu0 %970 }
 0x1a4   : > { %v1046_v28 = vadd.f32 %v1001_v10, %v950_v26  ;;  %v1031_v29 = vadd.f32 %v971_v27, %v935_v7  ;;  %v946_v10 = vld [vmem:[#allocation2 + $0x70] sm:$0xff]  ;;  %v945_v27 = vld [vmem:[#allocation2 + $0x68] sm:$0xff] }
 0x1a6   : > { %1079 = vst.msk [vmem:[#allocation2 + $0x90] sm:$0xff] %vm1060_vm3, %v1046_v28  ;;  %1064 = vst.msk [vmem:[#allocation2 + $0x18] sm:$0xff] %vm1060_vm3, %v1031_v29 }
 0x1a7   : > { %v973_v32 = vpop.xlane.xlu1 %972  ;;  %v1003_v33 = vpop.xlane.xlu0 %1002 }
 0x1a8   : > { %v1032_v34 = vadd.f32 %v973_v32, %v936_v30  ;;  %v1047_v35 = vadd.f32 %v1003_v33, %v951_v31  ;;  %v962_v32 = vld [vmem:[#allocation2 + $0xf0] sm:$0xff]  ;;  %v961_v33 = vld [vmem:[#allocation2 + $0xe8] sm:$0xff] }
 0x1aa   : > { %1065 = vst.msk [vmem:[#allocation2 + $0x20] sm:$0xff] %vm1060_vm3, %v1032_v34  ;;  %1080 = vst.msk [vmem:[#allocation2 + $0x98] sm:$0xff] %vm1060_vm3, %v1047_v35 }
 0x1ab   : > { %v1005_v38 = vpop.xlane.xlu1 %1004  ;;  %v969_v39 = vpop.xlane.xlu0 %968 }
 0x1ac   : > { %v1048_v9 = vadd.f32 %v1005_v38, %v952_v36  ;;  %v1030_v40 = vadd.f32 %v969_v39, %v934_v37  ;;  %v947_v38 = vld [vmem:[#allocation2 + $0x78] sm:$0xff] }
 0x1ae   : > { %1081 = vst.msk [vmem:[#allocation2 + $0xa0] sm:$0xff] %vm1060_vm3, %v1048_v9  ;;  %1063 = vst.msk [vmem:[#allocation2 + $0x10] sm:$0xff] %vm1060_vm3, %v1030_v40  ;;  %v963_v40 = vld [vmem:[#allocation2 + $0xf8] sm:$0xff] }
 0x1af   : > { %v977_v17 = vpop.xlane.xlu1 %976  ;;  %v975_v42 = vpop.xlane.xlu0 %974 }
 0x1b0   : > { %v1034_v43 = vadd.f32 %v977_v17, %v938_v12  ;;  %v1033_v44 = vadd.f32 %v975_v42, %v937_v41  ;;  %v1117_v17 = vld [vmem:[#allocation2 + $0x80] sm:$0xff] (!%p2991_p0)  ;;  %v1118_v42 = vld [vmem:[#allocation2 + $0x88] sm:$0xff] (!%p2991_p0) }
 0x1b2   : > { %1067 = vst.msk [vmem:[#allocation2 + $0x30] sm:$0xff] %vm1060_vm3, %v1034_v43  ;;  %1066 = vst.msk [vmem:[#allocation2 + $0x28] sm:$0xff] %vm1060_vm3, %v1033_v44  ;;  %v1101_v43 = vld [vmem:[#allocation2] sm:$0xff] (!%p2991_p0)  ;;  %v3423_v44 = vpack.c.bf16 (!%p2991_p0), %v1118_v42, %v1117_v17  ;;  %v1217_v17 = vld [vmem:[%s4808_s4 + $0x38] sm:$0xff] (!%p2991_p0) }
 0x1b3   : > { %v1009_v47 = vpop.xlane.xlu1 %1008  ;;  %v1007_v48 = vpop.xlane.xlu0 %1006  ;;  %v1212_v42 = vld [vmem:[%s4808_s4 + $0x10] sm:$0xff] (!%p2991_p0) }
 0x1b4   : > { %v1050_v49 = vadd.f32 %v1009_v47, %v954_v45  ;;  %v1049_v50 = vadd.f32 %v1007_v48, %v953_v46  ;;  %v1102_v45 = vld [vmem:[#allocation2 + $0x8] sm:$0xff] (!%p2991_p0)  ;;  %v1119_v46 = vld [vmem:[#allocation2 + $0x90] sm:$0xff] (!%p2991_p0)  ;;  %v1120_v47 = vld [vmem:[#allocation2 + $0x98] sm:$0xff] (!%p2991_p0)  ;;  %3424 = vmatprep.subr.bf16.mxu0 (!%p2991_p0), %v3423_v44 }
 0x1b5   : > { %v3425_v48 = vpack.c.bf16 (!%p2991_p0), %v1102_v45, %v1101_v43  ;;  %v1218_v43 = vld [vmem:[%s4808_s4 + $0x40] sm:$0xff] (!%p2991_p0)  ;;  %v1213_v44 = vld [vmem:[%s4808_s4 + $0x18] sm:$0xff] (!%p2991_p0)  ;;  %v1219_v45 = vld [vmem:[%s4808_s4 + $0x48] sm:$0xff] (!%p2991_p0) }
 0x1b6   : > { %1083 = vst.msk [vmem:[#allocation2 + $0xb0] sm:$0xff] %vm1060_vm3, %v1050_v49  ;;  %1082 = vst.msk [vmem:[#allocation2 + $0xa8] sm:$0xff] %vm1060_vm3, %v1049_v50  ;;  %v3427_v49 = vpack.c.bf16 (!%p2991_p0), %v1120_v47, %v1119_v46  ;;  %v1103_v50 = vld [vmem:[#allocation2 + $0x10] sm:$0xff] (!%p2991_p0)  ;;  %v1214_v46 = vld [vmem:[%s4808_s4 + $0x20] sm:$0xff] (!%p2991_p0) }
 0x1b7   : > { %v981_v51 = vpop.xlane.xlu1 %980  ;;  %v979_v52 = vpop.xlane.xlu0 %978  ;;  %3426 = vmatpush3.bf16.msra.mxu0 (!%p2991_p0), %v3425_v48  ;;  %v1220_v47 = vld [vmem:[%s4808_s4 + $0x50] sm:$0xff] (!%p2991_p0)  ;;  %v1215_v48 = vld [vmem:[%s4808_s4 + $0x28] sm:$0xff] (!%p2991_p0) }
 0x1b8   : > { %v1036_v53 = vadd.f32 %v981_v51, %v940_v11  ;;  %v1035_v54 = vadd.f32 %v979_v52, %v939_v14  ;;  %v1104_v11 = vld [vmem:[#allocation2 + $0x18] sm:$0xff] (!%p2991_p0)  ;;  %v1121_v14 = vld [vmem:[#allocation2 + $0xa0] sm:$0xff] (!%p2991_p0)  ;;  %3428 = vmatprep.subr.bf16.mxu0 (!%p2991_p0), %v3427_v49 }
 0x1b9   : > { %v3429_v52 = vpack.c.bf16 (!%p2991_p0), %v1104_v11, %v1103_v50  ;;  %v1221_v49 = vld [vmem:[%s4808_s4 + $0x58] sm:$0xff] (!%p2991_p0)  ;;  %v1222_v50 = vld [vmem:[%s4808_s4 + $0x60] sm:$0xff] (!%p2991_p0)  ;;  %v1223_v11 = vld [vmem:[%s4808_s4 + $0x68] sm:$0xff] (!%p2991_p0) }
 0x1ba   : > { %1069 = vst.msk [vmem:[#allocation2 + $0x40] sm:$0xff] %vm1060_vm3, %v1036_v53  ;;  %1068 = vst.msk [vmem:[#allocation2 + $0x38] sm:$0xff] %vm1060_vm3, %v1035_v54  ;;  %v1105_v54 = vld [vmem:[#allocation2 + $0x20] sm:$0xff] (!%p2991_p0) }
 0x1bb   : > { %v1013_v57 = vpop.xlane.xlu1 %1012  ;;  %v1011_v58 = vpop.xlane.xlu0 %1010  ;;  %3430 = vmatpush3.bf16.msra.mxu0 (!%p2991_p0), %v3429_v52  ;;  %v1226_v52 = vld [vmem:[%s4808_s4 + $0x80] sm:$0xff] (!%p2991_p0) }
 0x1bc   : > { %v1052_v13 = vadd.f32 %v1013_v57, %v956_v55  ;;  %v1051_v16 = vadd.f32 %v1011_v58, %v955_v56  ;;  %v1106_v55 = vld [vmem:[#allocation2 + $0x28] sm:$0xff] (!%p2991_p0) }
 0x1bd   : > { %v1122_v51 = vld [vmem:[#allocation2 + $0xa8] sm:$0xff] (!%p2991_p0)  ;;  %v1123_v56 = vld [vmem:[#allocation2 + $0xb0] sm:$0xff] (!%p2991_p0)  ;;  %v3433_v58 = vpack.c.bf16 (!%p2991_p0), %v1106_v55, %v1105_v54  ;;  %v1229_v55 = vld [vmem:[%s4808_s4 + $0x98] sm:$0xff] (!%p2991_p0) }
 0x1be   : > { %1085 = vst.msk [vmem:[#allocation2 + $0xc0] sm:$0xff] %vm1060_vm3, %v1052_v13  ;;  %1084 = vst.msk [vmem:[#allocation2 + $0xb8] sm:$0xff] %vm1060_vm3, %v1051_v16  ;;  %v3431_v53 = vpack.c.bf16 (!%p2991_p0), %v1122_v51, %v1121_v14  ;;  %v1107_v16 = vld [vmem:[#allocation2 + $0x30] sm:$0xff] (!%p2991_p0)  ;;  %v1225_v51 = vld [vmem:[%s4808_s4 + $0x78] sm:$0xff] (!%p2991_p0) }
 0x1bf   : > { %v985_v61 = vpop.xlane.xlu1 %984  ;;  %v983_v62 = vpop.xlane.xlu0 %982  ;;  %v1224_v14 = vld [vmem:[%s4808_s4 + $0x70] sm:$0xff] (!%p2991_p0) }
 0x1c0   : > { %v1038_v63 = vadd.f32 %v985_v61, %v942_v59  ;;  %v1037_v0 = vadd.f32 %v983_v62, %v941_v60  ;;  %3432 = vmatprep.subr.bf16.mxu0 (!%p2991_p0), %v3431_v53  ;;  %v1098_v62 = vld [vmem:[%s4807_s3 + $0x8] sm:$0xff] (!%p2991_p0)  ;;  %v1228_v54 = vld [vmem:[%s4808_s4 + $0x90] sm:$0xff] (!%p2991_p0) }
 0x1c1   : > { %v1108_v59 = vld [vmem:[#allocation2 + $0x38] sm:$0xff] (!%p2991_p0)  ;;  %1197 = vmatprep.mubr.f32.mxu0 (!%p2991_p0), %v1098_v62  ;;  %3434 = vmatpush3.bf16.msra.mxu0 (!%p2991_p0), %v3433_v58  ;;  %v1227_v53 = vld [vmem:[%s4808_s4 + $0x88] sm:$0xff] (!%p2991_p0)  ;;  %v1232_v58 = vld [vmem:[%s4808_s4 + $0xb0] sm:$0xff] (!%p2991_p0) }
 0x1c2   : > { %1071 = vst.msk [vmem:[#allocation2 + $0x50] sm:$0xff] %vm1060_vm3, %v1038_v63  ;;  %1070 = vst.msk [vmem:[#allocation2 + $0x48] sm:$0xff] %vm1060_vm3, %v1037_v0  ;;  %v3437_v63 = vpack.c.bf16 (!%p2991_p0), %v1108_v59, %v1107_v16  ;;  %v1234_v16 = vld [vmem:[%s4808_s4 + $0xc0] sm:$0xff] (!%p2991_p0)  ;;  %v1235_v59 = vld [vmem:[%s4808_s4 + $0xc8] sm:$0xff] (!%p2991_p0) }
 0x1c3   : > { %v1017_v15 = vpop.xlane.xlu1 %1016  ;;  %v1015_v4 = vpop.xlane.xlu0 %1014  ;;  %v1238_v62 = vld [vmem:[%s4808_s4 + $0xe0] sm:$0xff] (!%p2991_p0) }
 0x1c4   : > { %v1054_v18 = vadd.f32 %v1017_v15, %v958_v1  ;;  %v1053_v5 = vadd.f32 %v1015_v4, %v957_v2  ;;  %v1109_v1 = vld [vmem:[#allocation2 + $0x40] sm:$0xff] (!%p2991_p0) }
 0x1c5   : > { %v1124_v57 = vld [vmem:[#allocation2 + $0xb8] sm:$0xff] (!%p2991_p0)  ;;  %v1125_v60 = vld [vmem:[#allocation2 + $0xc0] sm:$0xff] (!%p2991_p0) }
 0x1c6   : > { %1087 = vst.msk [vmem:[#allocation2 + $0xd0] sm:$0xff] %vm1060_vm3, %v1054_v18  ;;  %1086 = vst.msk [vmem:[#allocation2 + $0xc8] sm:$0xff] %vm1060_vm3, %v1053_v5  ;;  %v3435_v13 = vpack.c.bf16 (!%p2991_p0), %v1124_v57, %v1123_v56  ;;  %v1230_v56 = vld [vmem:[%s4808_s4 + $0xa0] sm:$0xff] (!%p2991_p0)  ;;  %v1231_v57 = vld [vmem:[%s4808_s4 + $0xa8] sm:$0xff] (!%p2991_p0) }
 0x1c7   : > { %v989_v8 = vpop.xlane.xlu1 %988  ;;  %v987_v19 = vpop.xlane.xlu0 %986 }
 0x1c8   : > { %v1040_v20 = vadd.f32 %v989_v8, %v944_v6  ;;  %v1039_v21 = vadd.f32 %v987_v19, %v943_v3  ;;  %3436 = vmatprep.subr.bf16.mxu0 (!%p2991_p0), %v3435_v13  ;;  %v1233_v13 = vld [vmem:[%s4808_s4 + $0xb8] sm:$0xff] (!%p2991_p0) }
 0x1c9   : > { %v1110_v2 = vld [vmem:[#allocation2 + $0x48] sm:$0xff] (!%p2991_p0)  ;;  %3438 = vmatpush3.bf16.msra.mxu0 (!%p2991_p0), %v3437_v63  ;;  %v1111_v6 = vld [vmem:[#allocation2 + $0x50] sm:$0xff] (!%p2991_p0) }
 0x1ca   : > { %1073 = vst.msk [vmem:[#allocation2 + $0x60] sm:$0xff] %vm1060_vm3, %v1040_v20  ;;  %1072 = vst.msk [vmem:[#allocation2 + $0x58] sm:$0xff] %vm1060_vm3, %v1039_v21  ;;  %v3441_v18 = vpack.c.bf16 (!%p2991_p0), %v1110_v2, %v1109_v1  ;;  %v1239_v63 = vld [vmem:[%s4808_s4 + $0xe8] sm:$0xff] (!%p2991_p0)  ;;  %v1241_v1 = vld [vmem:[%s4808_s4 + $0xf8] sm:$0xff] (!%p2991_p0)  ;;  %v3787_v2 = vmov (!%p2991_p0), 0  }
 0x1cb   : > { %v1021_v24 = vpop.xlane.xlu1 %1020  ;;  %v1019_v25 = vpop.xlane.xlu0 %1018  ;;  %3574 = vset.pattern.permute.xlu1 (!%p2991_p0), %v3787_v2  ;;  %3573 = vset.pattern.permute.xlu0 (!%p2991_p0), %v3787_v2 }
 0x1cc   : > { %v1056_v26 = vadd.f32 %v1021_v24, %v960_v22  ;;  %v1055_v7 = vadd.f32 %v1019_v25, %v959_v23 }
 0x1cd   : > { %v1126_v61 = vld [vmem:[#allocation2 + $0xc8] sm:$0xff] (!%p2991_p0)  ;;  %v1127_v15 = vld [vmem:[#allocation2 + $0xd0] sm:$0xff] (!%p2991_p0) }
 0x1ce   : > { %1089 = vst.msk [vmem:[#allocation2 + $0xe0] sm:$0xff] %vm1060_vm3, %v1056_v26  ;;  %1088 = vst.msk [vmem:[#allocation2 + $0xd8] sm:$0xff] %vm1060_vm3, %v1055_v7  ;;  %v3439_v0 = vpack.c.bf16 (!%p2991_p0), %v1126_v61, %v1125_v60  ;;  %v1236_v60 = vld [vmem:[%s4808_s4 + $0xd0] sm:$0xff] (!%p2991_p0)  ;;  %v1237_v61 = vld [vmem:[%s4808_s4 + $0xd8] sm:$0xff] (!%p2991_p0) }
 0x1cf   : > { %v993_v28 = vpop.xlane.xlu1 %992  ;;  %v991_v29 = vpop.xlane.xlu0 %990 }
 0x1d0   : > { %v1042_v30 = vadd.f32 %v993_v28, %v946_v10  ;;  %v1041_v31 = vadd.f32 %v991_v29, %v945_v27  ;;  %3440 = vmatprep.subr.bf16.mxu0 (!%p2991_p0), %v3439_v0  ;;  %v1097_v29 = vld [vmem:[%s4807_s3] sm:$0xff] (!%p2991_p0)  ;;  %v1240_v0 = vld [vmem:[%s4808_s4 + $0xf0] sm:$0xff] (!%p2991_p0) }
 0x1d1   : > { %v1112_v3 = vld [vmem:[#allocation2 + $0x58] sm:$0xff] (!%p2991_p0)  ;;  %3442 = vmatpush3.bf16.msra.mxu0 (!%p2991_p0), %v3441_v18  ;;  %v1113_v22 = vld [vmem:[#allocation2 + $0x60] sm:$0xff] (!%p2991_p0) }
 0x1d2   : > { %1075 = vst.msk [vmem:[#allocation2 + $0x70] sm:$0xff] %vm1060_vm3, %v1042_v30  ;;  %1074 = vst.msk [vmem:[#allocation2 + $0x68] sm:$0xff] %vm1060_vm3, %v1041_v31  ;;  %v3445_v20 = vpack.c.bf16 (!%p2991_p0), %v1112_v3, %v1111_v6  ;;  %v1100_v30 = vld [vmem:[%s4807_s3 + $0x18] sm:$0xff] (!%p2991_p0)  ;;  %v1099_v31 = vld [vmem:[%s4807_s3 + $0x10] sm:$0xff] (!%p2991_p0) }
 0x1d3   : > { %v1025_v34 = vpop.xlane.xlu1 %1024  ;;  %v1023_v35 = vpop.xlane.xlu0 %1022 }
 0x1d4   : > { %v1058_v36 = vadd.f32 %v1025_v34, %v962_v32  ;;  %v1057_v37 = vadd.f32 %v1023_v35, %v961_v33  ;;  %v1210_v32 = vld [vmem:[%s4808_s4] sm:$0xff] (!%p2991_p0)  ;;  %v1216_v33 = vld [vmem:[%s4808_s4 + $0x30] sm:$0xff] (!%p2991_p0) }
 0x1d5   : > { %v1128_v4 = vld [vmem:[#allocation2 + $0xd8] sm:$0xff] (!%p2991_p0)  ;;  %v1129_v8 = vld [vmem:[#allocation2 + $0xe0] sm:$0xff] (!%p2991_p0)  ;;  %3334 = vmatprep.mubr.msk.f32.mxu1 (!%p2991_p0), %vm1242_vm4, %v1216_v33 }
 0x1d6   : > { %1091 = vst.msk [vmem:[#allocation2 + $0xf0] sm:$0xff] %vm1060_vm3, %v1058_v36  ;;  %1090 = vst.msk [vmem:[#allocation2 + $0xe8] sm:$0xff] %vm1060_vm3, %v1057_v37  ;;  %v3443_v5 = vpack.c.bf16 (!%p2991_p0), %v1128_v4, %v1127_v15 }
 0x1d7   : > { %v995_v39 = vpop.xlane.xlu0 %994 }
 0x1d8   : > { %v1043_v9 = vadd.f32 %v995_v39, %v947_v38  ;;  %1096 = sbr.rel (%p2991_p0) target bundleno = 1150 (0x47e), region = 60  ;;  %3444 = vmatprep.subr.bf16.mxu0 (!%p2991_p0), %v3443_v5 }
 0x1d9   : > { %v1114_v23 = vld [vmem:[#allocation2 + $0x68] sm:$0xff] (!%p2991_p0)  ;;  %3446 = vmatpush3.bf16.msra.mxu0 (!%p2991_p0), %v3445_v20  ;;  %v1115_v10 = vld [vmem:[#allocation2 + $0x70] sm:$0xff] (!%p2991_p0) }
 0x1da   : > { %1076 = vst.msk [vmem:[#allocation2 + $0x78] sm:$0xff] %vm1060_vm3, %v1043_v9  ;;  %v3449_v26 = vpack.c.bf16 (!%p2991_p0), %v1114_v23, %v1113_v22 }
 0x1db   : > { %v1027_v12 = vpop.xlane.xlu0 %1026 }
 0x1dc   : > { %v1059_v41 = vadd.f32 %v1027_v12, %v963_v40 }
 0x1dd   : > { %v1130_v19 = vld [vmem:[#allocation2 + $0xe8] sm:$0xff] (!%p2991_p0)  ;;  %v1131_v24 = vld [vmem:[#allocation2 + $0xf0] sm:$0xff] (!%p2991_p0) }
 0x1de   : > { %1092 = vst.msk [vmem:[#allocation2 + $0xf8] sm:$0xff] %vm1060_vm3, %v1059_v41  ;;  %v3447_v21 = vpack.c.bf16 (!%p2991_p0), %v1130_v19, %v1129_v8  ;;  %v1211_v41 = vld [vmem:[%s4808_s4 + $0x8] sm:$0xff] (!%p2991_p0) }
 0x1e0   : > { %3448 = vmatprep.subr.bf16.mxu0 %v3447_v21 }
 0x1e1   : > { %v1116_v27 = vld [vmem:[#allocation2 + $0x78] sm:$0xff]  ;;  %3450 = vmatpush3.bf16.msra.mxu0 %v3449_v26 }
 0x1e2   : > { %v3453_v28 = vpack.c.bf16 %v1116_v27, %v1115_v10 }
 0x1e5   : > { %v1132_v25 = vld [vmem:[#allocation2 + $0xf8] sm:$0xff] }
 0x1e6   : > { %v3451_v7 = vpack.c.bf16 %v1132_v25, %v1131_v24 }
 0x1e8   : > { %3452 = vmatprep.subr.bf16.mxu0 %v3451_v7 }
 0x1e9   : > { %3454 = vmatpush3.bf16.msra.mxu0 %v3453_v28 }
 0x1ec   : > { %1198 = vmatmul.mubr.f32.vlgmr.msra.gmra.mrb[0].mxu0 %v1097_v29 }
 0x1ed   : > { %1202 = vmatprep.mubr.f32.mxu0 %v1100_v30 }
 0x1f0   : > { %1203 = vmatmul.mubr.f32.gmra.mrb[2].mxu0 %v1099_v31 }
 0x1f1   : > { %3325 = vmatprep.mubr.msk.f32.mxu0 %vm1242_vm4, %v1210_v32 }
 0x2bf   : > { %v3160_v34 = vpop.f32.mrb[0].mxu0 }
 0x2c0   : > { %v3161_v35 = vpop.f32.mrb[1].mxu0 }
 0x2c1   : > { %v3162_v36 = vadd.f32 %v3161_v35, %v3160_v34 }
 0x2c3   : > { %v3163_v37 = vpop.f32.mrb[2].mxu0  ;;  %v1208_v9 = vmax.f32 %v3162_v36, 0.0 }
 0x2c4   : > { %v3164_v38 = vpop.f32.mrb[3].mxu0 }
 0x2c5   : > { %v3165_v39 = vadd.f32 %v3164_v38, %v3163_v37 }
 0x2c7   : > { %v1209_v40 = vmax.f32 %v3165_v39, 0.0 }
 0x2c9   : > { %v3455_v12 = vpack.c.bf16 %v1209_v40, %v1208_v9 }
 0x2cb   : > { %3456 = vmatprep.subr.bf16.mxu0 %v3455_v12  ;;  %3493 = vmatprep.subr.bf16.mxu1 %v3455_v12 }
 0x2cc   : > { %3458 = vmatpush3.bf16.msra.mxu0 %v3455_v12  ;;  %3494 = vmatpush3.bf16.msra.mxu1 %v3455_v12 }
 0x2cf   : > { %3326 = vmatmul.mubr.msk.f32.vlgmr.msra.gmra.mrb[4].mxu0 %vm1242_vm4, %v1211_v41  ;;  %3335 = vmatmul.mubr.msk.f32.vlgmr.msra.gmra.mrb[0].mxu1 %vm1242_vm4, %v1217_v17 }
 0x2d0   : > { %3328 = vmatprep.mubr.msk.f32.mxu0 %vm1242_vm4, %v1212_v42  ;;  %3337 = vmatprep.mubr.msk.f32.mxu1 %vm1242_vm4, %v1218_v43 }
 0x2d3   : > { %3329 = vmatmul.mubr.msk.f32.gmra.mrb[6].mxu0 %vm1242_vm4, %v1213_v44  ;;  %3338 = vmatmul.mubr.msk.f32.gmra.mrb[2].mxu1 %vm1242_vm4, %v1219_v45 }
 0x2d4   : > { %3331 = vmatprep.mubr.msk.f32.mxu0 %vm1242_vm4, %v1214_v46  ;;  %3340 = vmatprep.mubr.msk.f32.mxu1 %vm1242_vm4, %v1220_v47 }
 0x2d7   : > { %3332 = vmatmul.mubr.msk.f32.gmra.mrb[8].mxu0 %vm1242_vm4, %v1215_v48  ;;  %3341 = vmatmul.mubr.msk.f32.gmra.mrb[4].mxu1 %vm1242_vm4, %v1221_v49 }
 0x2d8   : > { %3343 = vmatprep.mubr.msk.f32.mxu1 %vm1242_vm4, %v1222_v50 }
 0x2db   : > { %3344 = vmatmul.mubr.msk.f32.gmra.mrb[6].mxu1 %vm1242_vm4, %v1223_v11 }
 0x2dc   : > { %3346 = vmatprep.mubr.msk.f32.mxu1 %vm1242_vm4, %v1224_v14 }
 0x2df   : > { %3347 = vmatmul.mubr.msk.f32.gmra.mrb[8].mxu1 %vm1242_vm4, %v1225_v51 }
 0x2e0   : > { %3349 = vmatprep.mubr.msk.f32.mxu1 %vm1242_vm4, %v1226_v52 }
 0x2e3   : > { %3350 = vmatmul.mubr.msk.f32.gmra.mrb[10].mxu1 %vm1242_vm4, %v1227_v53 }
 0x2e4   : > { %3352 = vmatprep.mubr.msk.f32.mxu1 %vm1242_vm4, %v1228_v54 }
 0x2e7   : > { %3353 = vmatmul.mubr.msk.f32.gmra.mrb[12].mxu1 %vm1242_vm4, %v1229_v55 }
 0x2e8   : > { %3355 = vmatprep.mubr.msk.f32.mxu1 %vm1242_vm4, %v1230_v56 }
 0x2eb   : > { %3356 = vmatmul.mubr.msk.f32.gmra.mrb[14].mxu1 %vm1242_vm4, %v1231_v57 }
 0x2ec   : > { %3358 = vmatprep.mubr.msk.f32.mxu1 %vm1242_vm4, %v1232_v58  ;;  %v2013_v58 = vld [vmem:[%s4806_s2 + $0x8] sm:$0xff] }
 0x2ef   : > { %3359 = vmatmul.mubr.msk.f32.gmra.mrb[16].mxu1 %vm1242_vm4, %v1233_v13 }
 0x2f0   : > { %3361 = vmatprep.mubr.msk.f32.mxu1 %vm1242_vm4, %v1234_v16 }
 0x2f3   : > { %3362 = vmatmul.mubr.msk.f32.gmra.mrb[18].mxu1 %vm1242_vm4, %v1235_v59 }
 0x2f4   : > { %3364 = vmatprep.mubr.msk.f32.mxu1 %vm1242_vm4, %v1236_v60  ;;  %v2019_v60 = vld [vmem:[%s4806_s2 + $0x38] sm:$0xff] }
 0x2f7   : > { %3365 = vmatmul.mubr.msk.f32.gmra.mrb[20].mxu1 %vm1242_vm4, %v1237_v61 }
 0x2f8   : > { %3367 = vmatprep.mubr.msk.f32.mxu1 %vm1242_vm4, %v1238_v62 }
 0x2fb   : > { %3368 = vmatmul.mubr.msk.f32.gmra.mrb[22].mxu1 %vm1242_vm4, %v1239_v63 }
 0x2fc   : > { %3370 = vmatprep.mubr.msk.f32.mxu1 %vm1242_vm4, %v1240_v0 }
 0x2ff   : > { %3371 = vmatmul.mubr.msk.f32.gmra.mrb[24].mxu1 %vm1242_vm4, %v1241_v1  ;;  %v2012_v1 = vld [vmem:[%s4806_s2] sm:$0xff] }
 0x3a2   : > { %v3327_v15 = vpop.f32.mrb[4].mxu0  ;;  %v3336_v4 = vpop.f32.mrb[0].mxu1 }
 0x3a3   : > { %v3025_v18 = vmul.f32 -1.442695, %v3327_v15  ;;  %v3031_v5 = vmul.f32 -1.442695, %v3336_v4  ;;  %v1405_v6 = vpop.f32.mrb[5].mxu0  ;;  %v1435_v3 = vpop.f32.mrb[1].mxu1 }
 0x3a4   : > { %v3024_v8 = vmul.f32 -1.442695, %v1405_v6  ;;  %v3030_v19 = vmul.f32 -1.442695, %v1435_v3 }
 0x3a5   : > { %3575 = vpow2.f32 %v3025_v18 }
 0x3a6   : > { %3577 = vpow2.f32 %v3031_v5  ;;  %v3330_v20 = vpop.f32.mrb[6].mxu0  ;;  %v3339_v21 = vpop.f32.mrb[2].mxu1  ;;  %v2018_v5 = vld [vmem:[%s4806_s2 + $0x30] sm:$0xff] }
 0x3a7   : > { %3579 = vpow2.f32 %v3024_v8  ;;  %v3027_v22 = vmul.f32 -1.442695, %v3330_v20  ;;  %v3033_v23 = vmul.f32 -1.442695, %v3339_v21  ;;  %v1415_v24 = vpop.f32.mrb[7].mxu0  ;;  %v1445_v25 = vpop.f32.mrb[3].mxu1 }
 0x3a8   : > { %3581 = vpow2.f32 %v3030_v19  ;;  %v3026_v26 = vmul.f32 -1.442695, %v1415_v24  ;;  %v3032_v7 = vmul.f32 -1.442695, %v1445_v25  ;;  %v2015_v19 = vld [vmem:[%s4806_s2 + $0x18] sm:$0xff]  ;;  %v2021_v24 = vld [vmem:[%s4806_s2 + $0x48] sm:$0xff] }
 0x3a9   : > { %3583 = vpow2.f32 %v3027_v22 }
 0x3aa   : > { %3585 = vpow2.f32 %v3033_v23  ;;  %v3333_v10 = vpop.f32.mrb[8].mxu0  ;;  %v3342_v27 = vpop.f32.mrb[4].mxu1 }
 0x3ab   : > { %3587 = vpow2.f32 %v3026_v26  ;;  %v3029_v28 = vmul.f32 -1.442695, %v3333_v10  ;;  %v1425_v29 = vpop.f32.mrb[9].mxu0  ;;  %v3035_v30 = vmul.f32 -1.442695, %v3342_v27  ;;  %v1455_v31 = vpop.f32.mrb[5].mxu1 }
 0x3ac   : > { %3589 = vpow2.f32 %v3032_v7  ;;  %v3028_v32 = vmul.f32 -1.442695, %v1425_v29  ;;  %v3034_v33 = vmul.f32 -1.442695, %v1455_v31  ;;  %v2014_v27 = vld [vmem:[%s4806_s2 + $0x10] sm:$0xff]  ;;  %v2020_v31 = vld [vmem:[%s4806_s2 + $0x40] sm:$0xff] }
 0x3ad   : > { %3591 = vpow2.f32 %v3029_v28 }
 0x3ae   : > { %3593 = vpow2.f32 %v3028_v32  ;;  %v3345_v34 = vpop.f32.mrb[6].mxu1 }
 0x3af   : > { %v3576_v35 = vpop.eup %3575  ;;  %3595 = vpow2.f32 %v3035_v30  ;;  %v3037_v36 = vmul.f32 -1.442695, %v3345_v34  ;;  %v1465_v37 = vpop.f32.mrb[7].mxu1 }
 0x3b0   : > { %v3578_v38 = vpop.eup %3577  ;;  %v1661_v39 = vadd.f32 1.0, %v3576_v35  ;;  %3597 = vpow2.f32 %v3034_v33  ;;  %v3036_v62 = vmul.f32 -1.442695, %v1465_v37  ;;  %v2017_v35 = vld [vmem:[%s4806_s2 + $0x28] sm:$0xff] }
 0x3b1   : > { %v3580_v9 = vpop.eup %3579  ;;  %v1667_v40 = vadd.f32 1.0, %v3578_v38  ;;  %3599 = vpow2.f32 %v3037_v36 }
 0x3b2   : > { %v3582_v12 = vpop.eup %3581  ;;  %3601 = vrcp.f32 %v1661_v39  ;;  %v1660_v41 = vadd.f32 1.0, %v3580_v9  ;;  %v3348_v17 = vpop.f32.mrb[8].mxu1  ;;  %v2016_v9 = vld [vmem:[%s4806_s2 + $0x20] sm:$0xff] }
 0x3b3   : > { %v3584_v42 = vpop.eup %3583  ;;  %3603 = vrcp.f32 %v1667_v40  ;;  %v1666_v43 = vadd.f32 1.0, %v3582_v12  ;;  %v1475_v44 = vpop.f32.mrb[9].mxu1  ;;  %v3039_v15 = vmul.f32 -1.442695, %v3348_v17 }
 0x3b4   : > { %v3586_v45 = vpop.eup %3585  ;;  %3605 = vrcp.f32 %v1660_v41  ;;  %v1663_v46 = vadd.f32 1.0, %v3584_v42  ;;  %v3038_v6 = vmul.f32 -1.442695, %v1475_v44  ;;  %v2023_v42 = vld [vmem:[%s4806_s2 + $0x58] sm:$0xff] }
 0x3b5   : > { %v3588_v47 = vpop.eup %3587  ;;  %3607 = vrcp.f32 %v1666_v43  ;;  %v1669_v48 = vadd.f32 1.0, %v3586_v45 }
 0x3b6   : > { %v3590_v49 = vpop.eup %3589  ;;  %3609 = vrcp.f32 %v1663_v46  ;;  %v1662_v50 = vadd.f32 1.0, %v3588_v47  ;;  %v3351_v11 = vpop.f32.mrb[10].mxu1  ;;  %v2022_v46 = vld [vmem:[%s4806_s2 + $0x50] sm:$0xff] }
 0x3b7   : > { %v3592_v14 = vpop.eup %3591  ;;  %3611 = vrcp.f32 %v1669_v48  ;;  %v1668_v51 = vadd.f32 1.0, %v3590_v49  ;;  %v1485_v52 = vpop.f32.mrb[11].mxu1  ;;  %v3041_v20 = vmul.f32 -1.442695, %v3351_v11 }
 0x3b8   : > { %v3594_v53 = vpop.eup %3593  ;;  %3613 = vrcp.f32 %v1662_v50  ;;  %v1665_v54 = vadd.f32 1.0, %v3592_v14  ;;  %v3040_v25 = vmul.f32 -1.442695, %v1485_v52  ;;  %v2025_v50 = vld [vmem:[%s4806_s2 + $0x68] sm:$0xff] }
 0x3b9   : > { %v3596_v55 = vpop.eup %3595  ;;  %3615 = vrcp.f32 %v1668_v51  ;;  %v1664_v56 = vadd.f32 1.0, %v3594_v53 }
 0x3ba   : > { %v3598_v57 = vpop.eup %3597  ;;  %3617 = vrcp.f32 %v1665_v54  ;;  %v1671_v13 = vadd.f32 1.0, %v3596_v55  ;;  %v3354_v16 = vpop.f32.mrb[12].mxu1 }
 0x3bb   : > { %v3600_v59 = vpop.eup %3599  ;;  %3619 = vrcp.f32 %v1664_v56  ;;  %v1670_v61 = vadd.f32 1.0, %v3598_v57  ;;  %v1495_v63 = vpop.f32.mrb[13].mxu1  ;;  %v3043_v28 = vmul.f32 -1.442695, %v3354_v16 }
 0x3bc   : > { %v3602_v0 = vpop.eup %3601  ;;  %3621 = vrcp.f32 %v1671_v13  ;;  %v1673_v2 = vadd.f32 1.0, %v3600_v59  ;;  %v3042_v32 = vmul.f32 -1.442695, %v1495_v63 }
 0x3bd   : > { %v3604_v4 = vpop.eup %3603  ;;  %v2045_v18 = vmul.f32 %v3602_v0, %v2013_v58  ;;  %3623 = vrcp.f32 %v1670_v61  ;;  %1795 = vperm.xlu0 %3573, %v3602_v0  }
 0x3be   : > { %v3606_v3 = vpop.eup %3605  ;;  %v2051_v8 = vmul.f32 %v3604_v4, %v2019_v60  ;;  %3625 = vrcp.f32 %v1673_v2  ;;  %1825 = vperm.xlu1 %3574, %v3604_v4   ;;  %v3357_v21 = vpop.f32.mrb[14].mxu1 }
 0x3bf   : > { %v3608_v22 = vpop.eup %3607  ;;  %2077 = vst.msk [vmem:[#allocation4 + $0x8] sm:$0xff] %vm1060_vm3, %v2045_v18  ;;  %v2044_v23 = vmul.f32 %v3606_v3, %v2012_v1  ;;  %3627 = vpow2.f32 %v3036_v62  ;;  %v1505_v26 = vpop.f32.mrb[15].mxu1  ;;  %v3045_v36 = vmul.f32 -1.442695, %v3357_v21 }
 0x3c0   : > { %v3610_v7 = vpop.eup %3609  ;;  %2083 = vst.msk [vmem:[#allocation4 + $0x38] sm:$0xff] %vm1060_vm3, %v2051_v8  ;;  %v2050_v10 = vmul.f32 %v3608_v22, %v2018_v5  ;;  %3629 = vpow2.f32 %v3039_v15  ;;  %v3044_v40 = vmul.f32 -1.442695, %v1505_v26 }
 0x3c1   : > { %v3612_v29 = vpop.eup %3611  ;;  %2076 = vst.msk [vmem:[#allocation4] sm:$0xff] %vm1060_vm3, %v2044_v23  ;;  %v2047_v30 = vmul.f32 %v3610_v7, %v2015_v19  ;;  %3631 = vpow2.f32 %v3038_v6  ;;  %1790 = vperm.xlu0 %3573, %v3606_v3  }
 0x3c2   : > { %v3614_v33 = vpop.eup %3613  ;;  %2082 = vst.msk [vmem:[#allocation4 + $0x30] sm:$0xff] %vm1060_vm3, %v2050_v10  ;;  %v2053_v34 = vmul.f32 %v3612_v29, %v2021_v24  ;;  %3633 = vpow2.f32 %v3041_v20  ;;  %1805 = vperm.xlu1 %3574, %v3610_v7   ;;  %v3360_v37 = vpop.f32.mrb[16].mxu1 }
 0x3c3   : > { %v3616_v38 = vpop.eup %3615  ;;  %2079 = vst.msk [vmem:[#allocation4 + $0x18] sm:$0xff] %vm1060_vm3, %v2047_v30  ;;  %v2046_v39 = vmul.f32 %v3614_v33, %v2014_v27  ;;  %3635 = vpow2.f32 %v3040_v25  ;;  %v1515_v12 = vpop.f32.mrb[17].mxu1  ;;  %v3047_v43 = vmul.f32 -1.442695, %v3360_v37  ;;  %v2024_v27 = vld [vmem:[%s4806_s2 + $0x60] sm:$0xff]  ;;  %v2027_v30 = vld [vmem:[%s4806_s2 + $0x78] sm:$0xff] }
 0x3c4   : > { %v3618_v41 = vpop.eup %3617  ;;  %2085 = vst.msk [vmem:[#allocation4 + $0x48] sm:$0xff] %vm1060_vm3, %v2053_v34  ;;  %v2052_v17 = vmul.f32 %v3616_v38, %v2020_v31  ;;  %3637 = vpow2.f32 %v3043_v28  ;;  %v3046_v47 = vmul.f32 -1.442695, %v1515_v12  ;;  %v2026_v34 = vld [vmem:[%s4806_s2 + $0x70] sm:$0xff] }
 0x3c5   : > { %v3620_v44 = vpop.eup %3619  ;;  %2078 = vst.msk [vmem:[#allocation4 + $0x10] sm:$0xff] %vm1060_vm3, %v2046_v39  ;;  %v2049_v45 = vmul.f32 %v3618_v41, %v2017_v35  ;;  %1820 = vperm.xlu0 %3573, %v3608_v22   ;;  %3639 = vpow2.f32 %v3042_v32  ;;  %v2029_v39 = vld [vmem:[%s4806_s2 + $0x88] sm:$0xff] }
 0x3c6   : > { %v3622_v48 = vpop.eup %3621  ;;  %2084 = vst.msk [vmem:[#allocation4 + $0x40] sm:$0xff] %vm1060_vm3, %v2052_v17  ;;  %v2048_v49 = vmul.f32 %v3620_v44, %v2016_v9  ;;  %1835 = vperm.xlu1 %3574, %v3612_v29   ;;  %3641 = vpow2.f32 %v3045_v36  ;;  %v3363_v11 = vpop.f32.mrb[18].mxu1 }
 0x3c7   : > { %v3624_v14 = vpop.eup %3623  ;;  %2081 = vst.msk [vmem:[#allocation4 + $0x28] sm:$0xff] %vm1060_vm3, %v2049_v45  ;;  %v2055_v51 = vmul.f32 %v3622_v48, %v2023_v42  ;;  %3643 = vpow2.f32 %v3044_v40  ;;  %v3049_v52 = vmul.f32 -1.442695, %v3363_v11  ;;  %v1525_v53 = vpop.f32.mrb[19].mxu1 }
 0x3c8   : > { %v4429_v54 = vpop.eup %3625  ;;  %2080 = vst.msk [vmem:[#allocation4 + $0x20] sm:$0xff] %vm1060_vm3, %v2048_v49  ;;  %v2054_v55 = vmul.f32 %v3624_v14, %v2022_v46  ;;  %3645 = vpow2.f32 %v3047_v43  ;;  %v3048_v56 = vmul.f32 -1.442695, %v1525_v53  ;;  %v2032_v53 = vld [vmem:[%s4806_s2 + $0xa0] sm:$0xff] }
 0x3c9   : > { %v3628_v57 = vpop.eup %3627  ;;  %2087 = vst.msk [vmem:[#allocation4 + $0x58] sm:$0xff] %vm1060_vm3, %v2055_v51  ;;  %v2057_v58 = vmul.f32 %v4429_v54, %v2025_v50  ;;  %1830 = vperm.xlu0 %3573, %v3616_v38   ;;  %3647 = vpow2.f32 %v3046_v47 }
 0x3ca   : > { %v3630_v13 = vpop.eup %3629  ;;  %2086 = vst.msk [vmem:[#allocation4 + $0x50] sm:$0xff] %vm1060_vm3, %v2054_v55  ;;  %v1672_v16 = vadd.f32 1.0, %v3628_v57  ;;  %1800 = vperm.xlu1 %3574, %v3614_v33   ;;  %3649 = vpow2.f32 %v3049_v52  ;;  %v3366_v59 = vpop.f32.mrb[20].mxu1 }
 0x3cb   : > { %v3632_v60 = vpop.eup %3631  ;;  %2089 = vst.msk [vmem:[#allocation4 + $0x68] sm:$0xff] %vm1060_vm3, %v2057_v58  ;;  %v1675_v61 = vadd.f32 1.0, %v3630_v13  ;;  %3651 = vpow2.f32 %v3048_v56  ;;  %v1535_v62 = vpop.f32.mrb[21].mxu1  ;;  %v3051_v32 = vmul.f32 -1.442695, %v3366_v59  ;;  %v2035_v56 = vld [vmem:[%s4806_s2 + $0xb8] sm:$0xff] }
 0x3cc   : > { %v3634_v63 = vpop.eup %3633  ;;  %3653 = vrcp.f32 %v1672_v16  ;;  %v1674_v0 = vadd.f32 1.0, %v3632_v60  ;;  %v3050_v36 = vmul.f32 -1.442695, %v1535_v62  ;;  %v2034_v13 = vld [vmem:[%s4806_s2 + $0xb0] sm:$0xff]  ;;  %v2037_v60 = vld [vmem:[%s4806_s2 + $0xc8] sm:$0xff] }
 0x3cd   : > { %v3636_v1 = vpop.eup %3635  ;;  %3655 = vrcp.f32 %v1675_v61  ;;  %v1677_v2 = vadd.f32 1.0, %v3634_v63  ;;  %1810 = vperm.xlu0 %3573, %v3620_v44   ;;  %v2031_v44 = vld [vmem:[%s4806_s2 + $0x98] sm:$0xff]  ;;  %v2036_v63 = vld [vmem:[%s4806_s2 + $0xc0] sm:$0xff] }
 0x3ce   : > { %v3638_v15 = vpop.eup %3637  ;;  %3657 = vrcp.f32 %v1674_v0  ;;  %v1676_v4 = vadd.f32 1.0, %v3636_v1  ;;  %1815 = vperm.xlu1 %3574, %v3618_v41   ;;  %v3369_v18 = vpop.f32.mrb[22].mxu1  ;;  %v2028_v41 = vld [vmem:[%s4806_s2 + $0x80] sm:$0xff] }
 0x3cf   : > { %v3640_v5 = vpop.eup %3639  ;;  %3659 = vrcp.f32 %v1677_v2  ;;  %v1679_v6 = vadd.f32 1.0, %v3638_v15  ;;  %v1545_v3 = vpop.f32.mrb[23].mxu1  ;;  %v3053_v9 = vmul.f32 -1.442695, %v3369_v18 }
 0x3d0   : > { %v3642_v8 = vpop.eup %3641  ;;  %3661 = vrcp.f32 %v1676_v4  ;;  %v1678_v19 = vadd.f32 1.0, %v3640_v5  ;;  %v3052_v17 = vmul.f32 -1.442695, %v1545_v3 }
 0x3d1   : > { %v3644_v20 = vpop.eup %3643  ;;  %3663 = vrcp.f32 %v1679_v6  ;;  %v1681_v21 = vadd.f32 1.0, %v3642_v8  ;;  %1840 = vperm.xlu0 %3573, %v3624_v14   ;;  %v2033_v14 = vld [vmem:[%s4806_s2 + $0xa8] sm:$0xff] }
 0x3d2   : > { %v3646_v22 = vpop.eup %3645  ;;  %3665 = vrcp.f32 %v1678_v19  ;;  %v1680_v23 = vadd.f32 1.0, %v3644_v20  ;;  %1845 = vperm.xlu1 %3574, %v3622_v48   ;;  %v3372_v24 = vpop.f32.mrb[24].mxu1  ;;  %v2030_v48 = vld [vmem:[%s4806_s2 + $0x90] sm:$0xff] }
 0x3d3   : > { %v3648_v25 = vpop.eup %3647  ;;  %3667 = vrcp.f32 %v1681_v21  ;;  %v1683_v26 = vadd.f32 1.0, %v3646_v22  ;;  %v1555_v7 = vpop.f32.mrb[25].mxu1  ;;  %v3055_v45 = vmul.f32 -1.442695, %v3372_v24 }
 0x3d4   : > { %v3650_v10 = vpop.eup %3649  ;;  %3669 = vrcp.f32 %v1680_v23  ;;  %v1682_v28 = vadd.f32 1.0, %v3648_v25  ;;  %v3054_v49 = vmul.f32 -1.442695, %v1555_v7  ;;  %v2038_v7 = vld [vmem:[%s4806_s2 + $0xd0] sm:$0xff] }
 0x3d5   : > { %v3652_v29 = vpop.eup %3651  ;;  %3671 = vrcp.f32 %v1683_v26  ;;  %v1685_v31 = vadd.f32 1.0, %v3650_v10  ;;  %v2039_v26 = vld [vmem:[%s4806_s2 + $0xd8] sm:$0xff] }
 0x3d6   : > { %v3654_v33 = vpop.eup %3653  ;;  %3673 = vrcp.f32 %v1682_v28  ;;  %v1684_v35 = vadd.f32 1.0, %v3652_v29  ;;  %1855 = vperm.xlu1 %3574, %v4429_v54  }
 0x3d7   : > { %v3656_v37 = vpop.eup %3655  ;;  %v2056_v38 = vmul.f32 %v3654_v33, %v2024_v27  ;;  %3675 = vrcp.f32 %v1685_v31  ;;  %1850 = vperm.xlu0 %3573, %v3654_v33   ;;  %v2041_v27 = vld [vmem:[%s4806_s2 + $0xe8] sm:$0xff]  ;;  %v2043_v33 = vld [vmem:[%s4806_s2 + $0xf8] sm:$0xff] }
 0x3d8   : > { %v3658_v40 = vpop.eup %3657  ;;  %v2059_v12 = vmul.f32 %v3656_v37, %v2027_v30  ;;  %3677 = vrcp.f32 %v1684_v35  ;;  %v2040_v30 = vld [vmem:[%s4806_s2 + $0xe0] sm:$0xff] }
 0x3d9   : > { %v3660_v42 = vpop.eup %3659  ;;  %2088 = vst.msk [vmem:[#allocation4 + $0x60] sm:$0xff] %vm1060_vm3, %v2056_v38  ;;  %v2058_v43 = vmul.f32 %v3658_v40, %v2026_v34  ;;  %3679 = vpow2.f32 %v3051_v32 }
 0x3da   : > { %v3662_v46 = vpop.eup %3661  ;;  %2091 = vst.msk [vmem:[#allocation4 + $0x78] sm:$0xff] %vm1060_vm3, %v2059_v12  ;;  %v2061_v47 = vmul.f32 %v3660_v42, %v2029_v39  ;;  %3681 = vpow2.f32 %v3050_v36  ;;  %1865 = vperm.xlu1 %3574, %v3656_v37   ;;  %v2042_v36 = vld [vmem:[%s4806_s2 + $0xf0] sm:$0xff]  ;;  %v1757_v12 = vld [vmem:[%s4805_s1 + $0x8] sm:$0xff] }
 0x3db   : > { %v3664_v50 = vpop.eup %3663  ;;  %2090 = vst.msk [vmem:[#allocation4 + $0x70] sm:$0xff] %vm1060_vm3, %v2058_v43  ;;  %v2060_v11 = vmul.f32 %v3662_v46, %v2028_v41  ;;  %3683 = vpow2.f32 %v3053_v9  ;;  %1860 = vperm.xlu0 %3573, %v3658_v40   ;;  %v1763_v41 = vld [vmem:[%s4805_s1 + $0x38] sm:$0xff] }
 0x3dc   : > { %v3666_v51 = vpop.eup %3665  ;;  %2093 = vst.msk [vmem:[#allocation4 + $0x88] sm:$0xff] %vm1060_vm3, %v2061_v47  ;;  %v2063_v52 = vmul.f32 %v3664_v50, %v2031_v44  ;;  %3685 = vpow2.f32 %v3052_v17 }
 0x3dd   : > { %v3668_v54 = vpop.eup %3667  ;;  %2092 = vst.msk [vmem:[#allocation4 + $0x80] sm:$0xff] %vm1060_vm3, %v2060_v11  ;;  %v2062_v55 = vmul.f32 %v3666_v51, %v2030_v48  ;;  %3687 = vpow2.f32 %v3055_v45  ;;  %v1756_v45 = vld [vmem:[%s4805_s1] sm:$0xff]  ;;  %v1762_v11 = vld [vmem:[%s4805_s1 + $0x30] sm:$0xff] }
 0x3de   : > { %v3670_v57 = vpop.eup %3669  ;;  %2095 = vst.msk [vmem:[#allocation4 + $0x98] sm:$0xff] %vm1060_vm3, %v2063_v52  ;;  %v2065_v58 = vmul.f32 %v3668_v54, %v2033_v14  ;;  %1875 = vperm.xlu1 %3574, %v3660_v42   ;;  %3689 = vpow2.f32 %v3054_v49  ;;  %v1765_v14 = vld [vmem:[%s4805_s1 + $0x48] sm:$0xff] }
 0x3df   : > { %v3672_v16 = vpop.eup %3671  ;;  %2094 = vst.msk [vmem:[#allocation4 + $0x90] sm:$0xff] %vm1060_vm3, %v2062_v55  ;;  %v2064_v59 = vmul.f32 %v3670_v57, %v2032_v53  ;;  %1870 = vperm.xlu0 %3573, %v3662_v46   ;;  %v1759_v46 = vld [vmem:[%s4805_s1 + $0x18] sm:$0xff]  ;;  %v1764_v55 = vld [vmem:[%s4805_s1 + $0x40] sm:$0xff] }
 0x3e0   : > { %v3674_v61 = vpop.eup %3673  ;;  %2097 = vst.msk [vmem:[#allocation4 + $0xa8] sm:$0xff] %vm1060_vm3, %v2065_v58  ;;  %v2067_v62 = vmul.f32 %v3672_v16, %v2035_v56  ;;  %v1758_v56 = vld [vmem:[%s4805_s1 + $0x10] sm:$0xff] }
 0x3e1   : > { %v3676_v0 = vpop.eup %3675  ;;  %2096 = vst.msk [vmem:[#allocation4 + $0xa0] sm:$0xff] %vm1060_vm3, %v2064_v59  ;;  %v2066_v1 = vmul.f32 %v3674_v61, %v2034_v13  ;;  %v1760_v59 = vld [vmem:[%s4805_s1 + $0x20] sm:$0xff] }
 0x3e2   : > { %v3678_v2 = vpop.eup %3677  ;;  %2099 = vst.msk [vmem:[#allocation4 + $0xb8] sm:$0xff] %vm1060_vm3, %v2067_v62  ;;  %v2069_v15 = vmul.f32 %v3676_v0, %v2037_v60  ;;  %1885 = vperm.xlu1 %3574, %v3664_v50   ;;  %v1761_v60 = vld [vmem:[%s4805_s1 + $0x28] sm:$0xff] }
 0x3e3   : > { %v3680_v4 = vpop.eup %3679  ;;  %2098 = vst.msk [vmem:[#allocation4 + $0xb0] sm:$0xff] %vm1060_vm3, %v2066_v1  ;;  %v2068_v18 = vmul.f32 %v3678_v2, %v2036_v63  ;;  %1880 = vperm.xlu0 %3573, %v3666_v51   ;;  %v1766_v1 = vld [vmem:[%s4805_s1 + $0x50] sm:$0xff] }
 0x3e4   : > { %v3682_v5 = vpop.eup %3681  ;;  %2101 = vst.msk [vmem:[#allocation4 + $0xc8] sm:$0xff] %vm1060_vm3, %v2069_v15  ;;  %v1687_v6 = vadd.f32 1.0, %v3680_v4 }
 0x3e5   : > { %v3684_v3 = vpop.eup %3683  ;;  %2100 = vst.msk [vmem:[#allocation4 + $0xc0] sm:$0xff] %vm1060_vm3, %v2068_v18  ;;  %v1686_v8 = vadd.f32 1.0, %v3682_v5 }
 0x3e6   : > { %v3686_v19 = vpop.eup %3685  ;;  %3691 = vrcp.f32 %v1687_v6  ;;  %v1689_v20 = vadd.f32 1.0, %v3684_v3  ;;  %1895 = vperm.xlu1 %3574, %v3668_v54   ;;  %v1769_v6 = vld [vmem:[%s4805_s1 + $0x68] sm:$0xff]  ;;  %v1768_v3 = vld [vmem:[%s4805_s1 + $0x60] sm:$0xff] }
 0x3e7   : > { %v3688_v21 = vpop.eup %3687  ;;  %3693 = vrcp.f32 %v1686_v8  ;;  %v1688_v22 = vadd.f32 1.0, %v3686_v19  ;;  %1890 = vperm.xlu0 %3573, %v3670_v57  }
 0x3e8   : > { %v3690_v23 = vpop.eup %3689  ;;  %3695 = vrcp.f32 %v1689_v20  ;;  %v1691_v24 = vadd.f32 1.0, %v3688_v21 }
 0x3e9   : > { %3697 = vrcp.f32 %v1688_v22  ;;  %v1690_v25 = vadd.f32 1.0, %v3690_v23  ;;  %v1771_v22 = vld [vmem:[%s4805_s1 + $0x78] sm:$0xff]  ;;  %v1770_v23 = vld [vmem:[%s4805_s1 + $0x70] sm:$0xff] }
 0x3ea   : > { %3699 = vrcp.f32 %v1691_v24  ;;  %1905 = vperm.xlu1 %3574, %v3672_v16  }
 0x3eb   : > { %3701 = vrcp.f32 %v1690_v25  ;;  %1900 = vperm.xlu0 %3573, %v3674_v61  }
 0x3ee   : > { %1915 = vperm.xlu1 %3574, %v3676_v0  }
 0x3ef   : > { %1910 = vperm.xlu0 %3573, %v3678_v2   ;;  %v1767_v2 = vld [vmem:[%s4805_s1 + $0x58] sm:$0xff] }
 0x3f0   : > { %v3692_v10 = vpop.eup %3691 }
 0x3f1   : > { %v3694_v28 = vpop.eup %3693  ;;  %v2071_v29 = vmul.f32 %v3692_v10, %v2039_v26 }
 0x3f2   : > { %v3696_v31 = vpop.eup %3695  ;;  %v2070_v32 = vmul.f32 %v3694_v28, %v2038_v7  ;;  %1925 = vperm.xlu1 %3574, %v3692_v10   ;;  %v1773_v10 = vld [vmem:[%s4805_s1 + $0x88] sm:$0xff] }
 0x3f3   : > { %v3698_v34 = vpop.eup %3697  ;;  %2103 = vst.msk [vmem:[#allocation4 + $0xd8] sm:$0xff] %vm1060_vm3, %v2071_v29  ;;  %v2073_v35 = vmul.f32 %v3696_v31, %v2041_v27  ;;  %1920 = vperm.xlu0 %3573, %v3694_v28   ;;  %v1772_v27 = vld [vmem:[%s4805_s1 + $0x80] sm:$0xff] }
 0x3f4   : > { %v3700_v37 = vpop.eup %3699  ;;  %2102 = vst.msk [vmem:[#allocation4 + $0xd0] sm:$0xff] %vm1060_vm3, %v2070_v32  ;;  %v2072_v38 = vmul.f32 %v3698_v34, %v2040_v30  ;;  %v1775_v32 = vld [vmem:[%s4805_s1 + $0x98] sm:$0xff] }
 0x3f5   : > { %v3702_v39 = vpop.eup %3701  ;;  %2105 = vst.msk [vmem:[#allocation4 + $0xe8] sm:$0xff] %vm1060_vm3, %v2073_v35  ;;  %v2075_v9 = vmul.f32 %v3700_v37, %v2043_v33  ;;  %v1774_v33 = vld [vmem:[%s4805_s1 + $0x90] sm:$0xff] }
 0x3f6   : > { %2104 = vst.msk [vmem:[#allocation4 + $0xe0] sm:$0xff] %vm1060_vm3, %v2072_v38  ;;  %v2074_v40 = vmul.f32 %v3702_v39, %v2042_v36  ;;  %1935 = vperm.xlu1 %3574, %v3696_v31   ;;  %v1777_v38 = vld [vmem:[%s4805_s1 + $0xa8] sm:$0xff] }
 0x3f7   : > { %2107 = vst.msk [vmem:[#allocation4 + $0xf8] sm:$0xff] %vm1060_vm3, %v2075_v9  ;;  %1930 = vperm.xlu0 %3573, %v3698_v34  }
 0x3f8   : > { %2106 = vst.msk [vmem:[#allocation4 + $0xf0] sm:$0xff] %vm1060_vm3, %v2074_v40 }
 0x3fa   : > { %1945 = vperm.xlu1 %3574, %v3700_v37  }
 0x3fb   : > { %1940 = vperm.xlu0 %3573, %v3702_v39   ;;  %v1776_v39 = vld [vmem:[%s4805_s1 + $0xa0] sm:$0xff] }
 0x43c   : > { %v1796_v17 = vpop.permute.xlu0 %1795 }
 0x43d   : > { %v1826_v42 = vpop.permute.xlu1 %1825  ;;  %v1949_v43 = vmul.f32 %v1796_v17, %v1757_v12  ;;  %v1779_v17 = vld [vmem:[%s4805_s1 + $0xb8] sm:$0xff] }
 0x43e   : > { %v1955_v44 = vmul.f32 %v1826_v42, %v1763_v41  ;;  %v1778_v42 = vld [vmem:[%s4805_s1 + $0xb0] sm:$0xff] }
 0x43f   : > { %1981 = vst.msk [vmem:[#allocation3 + $0x8] sm:$0xff] %vm574_vm2, %v1949_v43 }
 0x440   : > { %1987 = vst.msk [vmem:[#allocation3 + $0x38] sm:$0xff] %vm574_vm2, %v1955_v44  ;;  %v1791_v47 = vpop.permute.xlu0 %1790 }
 0x441   : > { %v1948_v48 = vmul.f32 %v1791_v47, %v1756_v45  ;;  %v1806_v49 = vpop.permute.xlu1 %1805  ;;  %v1781_v47 = vld [vmem:[%s4805_s1 + $0xc8] sm:$0xff] }
 0x442   : > { %v1951_v50 = vmul.f32 %v1806_v49, %v1759_v46 }
 0x443   : > { %1980 = vst.msk [vmem:[#allocation3] sm:$0xff] %vm574_vm2, %v1948_v48  ;;  %v1780_v48 = vld [vmem:[%s4805_s1 + $0xc0] sm:$0xff] }
 0x444   : > { %1983 = vst.msk [vmem:[#allocation3 + $0x18] sm:$0xff] %vm574_vm2, %v1951_v50  ;;  %v1821_v51 = vpop.permute.xlu0 %1820 }
 0x445   : > { %v1954_v52 = vmul.f32 %v1821_v51, %v1762_v11  ;;  %v1836_v53 = vpop.permute.xlu1 %1835  ;;  %v1783_v51 = vld [vmem:[%s4805_s1 + $0xd8] sm:$0xff] }
 0x446   : > { %v1957_v54 = vmul.f32 %v1836_v53, %v1765_v14 }
 0x447   : > { %1986 = vst.msk [vmem:[#allocation3 + $0x30] sm:$0xff] %vm574_vm2, %v1954_v52  ;;  %v1782_v52 = vld [vmem:[%s4805_s1 + $0xd0] sm:$0xff] }
 0x448   : > { %1989 = vst.msk [vmem:[#allocation3 + $0x48] sm:$0xff] %vm574_vm2, %v1957_v54  ;;  %v1831_v57 = vpop.permute.xlu0 %1830 }
 0x449   : > { %v1956_v58 = vmul.f32 %v1831_v57, %v1764_v55  ;;  %v1801_v13 = vpop.permute.xlu1 %1800  ;;  %v1785_v57 = vld [vmem:[%s4805_s1 + $0xe8] sm:$0xff] }
 0x44a   : > { %v1950_v16 = vmul.f32 %v1801_v13, %v1758_v56 }
 0x44b   : > { %1988 = vst.msk [vmem:[#allocation3 + $0x40] sm:$0xff] %vm574_vm2, %v1956_v58  ;;  %v1784_v58 = vld [vmem:[%s4805_s1 + $0xe0] sm:$0xff] }
 0x44c   : > { %1982 = vst.msk [vmem:[#allocation3 + $0x10] sm:$0xff] %vm574_vm2, %v1950_v16  ;;  %v1811_v61 = vpop.permute.xlu0 %1810 }
 0x44d   : > { %v1816_v62 = vpop.permute.xlu1 %1815  ;;  %v1952_v63 = vmul.f32 %v1811_v61, %v1760_v59  ;;  %v1787_v61 = vld [vmem:[%s4805_s1 + $0xf8] sm:$0xff] }
 0x44e   : > { %v1953_v0 = vmul.f32 %v1816_v62, %v1761_v60  ;;  %v1786_v62 = vld [vmem:[%s4805_s1 + $0xf0] sm:$0xff] }
 0x44f   : > { %1984 = vst.msk [vmem:[#allocation3 + $0x20] sm:$0xff] %vm574_vm2, %v1952_v63 }
 0x450   : > { %1985 = vst.msk [vmem:[#allocation3 + $0x28] sm:$0xff] %vm574_vm2, %v1953_v0  ;;  %v1841_v15 = vpop.permute.xlu0 %1840 }
 0x451   : > { %v1846_v4 = vpop.permute.xlu1 %1845  ;;  %v1958_v18 = vmul.f32 %v1841_v15, %v1766_v1 }
 0x452   : > { %v1959_v5 = vmul.f32 %v1846_v4, %v1767_v2 }
 0x453   : > { %1990 = vst.msk [vmem:[#allocation3 + $0x50] sm:$0xff] %vm574_vm2, %v1958_v18 }
 0x454   : > { %1991 = vst.msk [vmem:[#allocation3 + $0x58] sm:$0xff] %vm574_vm2, %v1959_v5 }
 0x455   : > { %v1856_v8 = vpop.permute.xlu1 %1855 }
 0x456   : > { %v1961_v19 = vmul.f32 %v1856_v8, %v1769_v6  ;;  %v1851_v20 = vpop.permute.xlu0 %1850 }
 0x457   : > { %v1960_v21 = vmul.f32 %v1851_v20, %v1768_v3 }
 0x458   : > { %1993 = vst.msk [vmem:[#allocation3 + $0x68] sm:$0xff] %vm574_vm2, %v1961_v19 }
 0x459   : > { %1992 = vst.msk [vmem:[#allocation3 + $0x60] sm:$0xff] %vm574_vm2, %v1960_v21  ;;  %v1866_v24 = vpop.permute.xlu1 %1865 }
 0x45a   : > { %v1963_v25 = vmul.f32 %v1866_v24, %v1771_v22  ;;  %v1861_v26 = vpop.permute.xlu0 %1860 }
 0x45b   : > { %v1962_v7 = vmul.f32 %v1861_v26, %v1770_v23 }
 0x45c   : > { %1995 = vst.msk [vmem:[#allocation3 + $0x78] sm:$0xff] %vm574_vm2, %v1963_v25 }
 0x45d   : > { %1994 = vst.msk [vmem:[#allocation3 + $0x70] sm:$0xff] %vm574_vm2, %v1962_v7  ;;  %v1876_v28 = vpop.permute.xlu1 %1875 }
 0x45e   : > { %v1965_v29 = vmul.f32 %v1876_v28, %v1773_v10  ;;  %v1871_v30 = vpop.permute.xlu0 %1870 }
 0x45f   : > { %v1964_v31 = vmul.f32 %v1871_v30, %v1772_v27 }
 0x460   : > { %1997 = vst.msk [vmem:[#allocation3 + $0x88] sm:$0xff] %vm574_vm2, %v1965_v29 }
 0x461   : > { %1996 = vst.msk [vmem:[#allocation3 + $0x80] sm:$0xff] %vm574_vm2, %v1964_v31  ;;  %v1886_v34 = vpop.permute.xlu1 %1885 }
 0x462   : > { %v1967_v35 = vmul.f32 %v1886_v34, %v1775_v32  ;;  %v1881_v36 = vpop.permute.xlu0 %1880 }
 0x463   : > { %v1966_v37 = vmul.f32 %v1881_v36, %v1774_v33 }
 0x464   : > { %1999 = vst.msk [vmem:[#allocation3 + $0x98] sm:$0xff] %vm574_vm2, %v1967_v35 }
 0x465   : > { %1998 = vst.msk [vmem:[#allocation3 + $0x90] sm:$0xff] %vm574_vm2, %v1966_v37  ;;  %v1896_v9 = vpop.permute.xlu1 %1895 }
 0x466   : > { %v1969_v40 = vmul.f32 %v1896_v9, %v1777_v38  ;;  %v1891_v12 = vpop.permute.xlu0 %1890 }
 0x467   : > { %v1968_v41 = vmul.f32 %v1891_v12, %v1776_v39 }
 0x468   : > { %2001 = vst.msk [vmem:[#allocation3 + $0xa8] sm:$0xff] %vm574_vm2, %v1969_v40 }
 0x469   : > { %2000 = vst.msk [vmem:[#allocation3 + $0xa0] sm:$0xff] %vm574_vm2, %v1968_v41  ;;  %v1906_v43 = vpop.permute.xlu1 %1905 }
 0x46a   : > { %v1971_v44 = vmul.f32 %v1906_v43, %v1779_v17  ;;  %v1901_v45 = vpop.permute.xlu0 %1900 }
 0x46b   : > { %v1970_v46 = vmul.f32 %v1901_v45, %v1778_v42 }
 0x46c   : > { %2003 = vst.msk [vmem:[#allocation3 + $0xb8] sm:$0xff] %vm574_vm2, %v1971_v44 }
 0x46d   : > { %2002 = vst.msk [vmem:[#allocation3 + $0xb0] sm:$0xff] %vm574_vm2, %v1970_v46  ;;  %v1916_v49 = vpop.permute.xlu1 %1915 }
 0x46e   : > { %v1973_v50 = vmul.f32 %v1916_v49, %v1781_v47  ;;  %v1911_v11 = vpop.permute.xlu0 %1910 }
 0x46f   : > { %v1972_v14 = vmul.f32 %v1911_v11, %v1780_v48 }
 0x470   : > { %2005 = vst.msk [vmem:[#allocation3 + $0xc8] sm:$0xff] %vm574_vm2, %v1973_v50 }
 0x471   : > { %2004 = vst.msk [vmem:[#allocation3 + $0xc0] sm:$0xff] %vm574_vm2, %v1972_v14  ;;  %v1926_v53 = vpop.permute.xlu1 %1925 }
 0x472   : > { %v1975_v54 = vmul.f32 %v1926_v53, %v1783_v51  ;;  %v1921_v55 = vpop.permute.xlu0 %1920 }
 0x473   : > { %v1974_v56 = vmul.f32 %v1921_v55, %v1782_v52 }
 0x474   : > { %2007 = vst.msk [vmem:[#allocation3 + $0xd8] sm:$0xff] %vm574_vm2, %v1975_v54 }
 0x475   : > { %2006 = vst.msk [vmem:[#allocation3 + $0xd0] sm:$0xff] %vm574_vm2, %v1974_v56  ;;  %v1936_v13 = vpop.permute.xlu1 %1935 }
 0x476   : > { %v1977_v16 = vmul.f32 %v1936_v13, %v1785_v57  ;;  %v1931_v59 = vpop.permute.xlu0 %1930 }
 0x477   : > { %v1976_v60 = vmul.f32 %v1931_v59, %v1784_v58 }
 0x478   : > { %2009 = vst.msk [vmem:[#allocation3 + $0xe8] sm:$0xff] %vm574_vm2, %v1977_v16 }
 0x479   : > { %2008 = vst.msk [vmem:[#allocation3 + $0xe0] sm:$0xff] %vm574_vm2, %v1976_v60  ;;  %v1946_v63 = vpop.permute.xlu1 %1945 }
 0x47a   : > { %v1979_v0 = vmul.f32 %v1946_v63, %v1787_v61  ;;  %v1941_v1 = vpop.permute.xlu0 %1940 }
 0x47b   : > { %v1978_v2 = vmul.f32 %v1941_v1, %v1786_v62 }
 0x47c   : > { %2011 = vst.msk [vmem:[#allocation3 + $0xf8] sm:$0xff] %vm574_vm2, %v1979_v0 }
 0x47d   : > { %2010 = vst.msk [vmem:[#allocation3 + $0xf0] sm:$0xff] %vm574_vm2, %v1978_v2 }
 0x47e PF: > { %p3056_p1 = scmp.ne.s32.totalorder %s3763_s27, 1 }
 0x47f   : > { %v2144_v15 = vld [vmem:[%s3912_s19] sm:$0xf] (!%p3056_p1)  ;;  %vm2434_vm5 = vcmask (!%p3056_p1), 1043456   ;;  %vm2337_vm6 = vcmask (!%p3056_p1), 31744   ;;  %v2113_v18 = vld [vmem:[#allocation3 + $0x8] sm:$0xff] (!%p3056_p1)  ;;  %v2114_v5 = vld [vmem:[#allocation3 + $0x10] sm:$0xff] (!%p3056_p1) }
 0x480   : > { %2111 = sbr.rel (%p3056_p1) target bundleno = 1695 (0x69f), region = 64  ;;  %v2112_v4 = vld [vmem:[#allocation3] sm:$0xff] (!%p3056_p1)  ;;  %3373 = vmatprep.subr.msk.mxu0 (!%p3056_p1), %vm2434_vm5, %v2144_v15  ;;  %v3788_v6 = vmov (!%p3056_p1), 0   ;;  %v2115_v3 = vld [vmem:[#allocation3 + $0x18] sm:$0xff] (!%p3056_p1)  ;;  %v2162_v21 = vld [vmem:[#allocation4 + $0x88] sm:$0xff] (!%p3056_p1) }
 0x481   : > { %3375 = vmatprep.mubr.msk.f32.mxu0 (!%p3056_p1), %vm2337_vm6, %v2112_v4  ;;  %3374 = vmatpush3.msk.msra.mxu0 (!%p3056_p1), %vm2434_vm5, %v2144_v15  ;;  %v2161_v8 = vld [vmem:[#allocation4 + $0x80] sm:$0xff] (!%p3056_p1)  ;;  %v2146_v22 = vld [vmem:[#allocation4 + $0x8] sm:$0xff] (!%p3056_p1)  ;;  %v2118_v24 = vld [vmem:[#allocation3 + $0x30] sm:$0xff] (!%p3056_p1) }
 0x482   : > { %3704 = vset.pattern.permute.xlu1 (!%p3056_p1), %v3788_v6  ;;  %3376 = vmatmul.mubr.msk.f32.vlgmr.msra.gmra.mrb[0].mxu0 (!%p3056_p1), %vm2337_vm6, %v2113_v18  ;;  %v2145_v19 = vld [vmem:[#allocation4] sm:$0xff] (!%p3056_p1)  ;;  %v2117_v23 = vld [vmem:[#allocation3 + $0x28] sm:$0xff] (!%p3056_p1)  ;;  %v2163_v25 = vld [vmem:[#allocation4 + $0x90] sm:$0xff] (!%p3056_p1) }
 0x483   : > { %3703 = vset.pattern.permute.xlu0 (!%p3056_p1), %v3788_v6  ;;  %3378 = vmatprep.mubr.msk.f32.mxu0 (!%p3056_p1), %vm2337_vm6, %v2114_v5  ;;  %v2116_v20 = vld [vmem:[#allocation3 + $0x20] sm:$0xff] (!%p3056_p1)  ;;  %v2164_v26 = vld [vmem:[#allocation4 + $0x98] sm:$0xff] (!%p3056_p1)  ;;  %v2147_v27 = vld [vmem:[#allocation4 + $0x10] sm:$0xff] (!%p3056_p1) }
 0x484   : > { %2259 = vperm.xlu0 (!%p3056_p1), %3703, %v2161_v8   ;;  %2179 = vperm.xlu1 (!%p3056_p1), %3704, %v2145_v19   ;;  %v2119_v7 = vld [vmem:[#allocation3 + $0x38] sm:$0xff] (!%p3056_p1)  ;;  %v2120_v10 = vld [vmem:[#allocation3 + $0x40] sm:$0xff] (!%p3056_p1)  ;;  %v2121_v29 = vld [vmem:[#allocation3 + $0x48] sm:$0xff] (!%p3056_p1) }
 0x485   : > { %v2148_v28 = vld [vmem:[#allocation4 + $0x18] sm:$0xff] (!%p3056_p1)  ;;  %v2122_v30 = vld [vmem:[#allocation3 + $0x50] sm:$0xff] (!%p3056_p1)  ;;  %v2165_v31 = vld [vmem:[#allocation4 + $0xa0] sm:$0xff] (!%p3056_p1) }
 0x486   : > { %3379 = vmatmul.mubr.msk.f32.gmra.mrb[2].mxu0 (!%p3056_p1), %vm2337_vm6, %v2115_v3  ;;  %v2166_v32 = vld [vmem:[#allocation4 + $0xa8] sm:$0xff] (!%p3056_p1)  ;;  %v2123_v33 = vld [vmem:[#allocation3 + $0x58] sm:$0xff] (!%p3056_p1)  ;;  %v2124_v34 = vld [vmem:[#allocation3 + $0x60] sm:$0xff] (!%p3056_p1) }
 0x487   : > { %3381 = vmatprep.mubr.msk.f32.mxu0 %vm2337_vm6, %v2116_v20  ;;  %v2149_v35 = vld [vmem:[#allocation4 + $0x20] sm:$0xff]  ;;  %v2150_v36 = vld [vmem:[#allocation4 + $0x28] sm:$0xff]  ;;  %v2126_v38 = vld [vmem:[#allocation3 + $0x70] sm:$0xff] }
 0x488   : > { %2264 = vperm.xlu0 %3703, %v2162_v21   ;;  %2184 = vperm.xlu1 %3704, %v2146_v22   ;;  %v2125_v37 = vld [vmem:[#allocation3 + $0x68] sm:$0xff]  ;;  %v2167_v39 = vld [vmem:[#allocation4 + $0xb0] sm:$0xff]  ;;  %v2168_v9 = vld [vmem:[#allocation4 + $0xb8] sm:$0xff] }
 0x489   : > { %v2127_v40 = vld [vmem:[#allocation3 + $0x78] sm:$0xff]  ;;  %v2128_v12 = vld [vmem:[#allocation3 + $0x80] sm:$0xff]  ;;  %v2151_v41 = vld [vmem:[#allocation4 + $0x30] sm:$0xff] }
 0x48a   : > { %3382 = vmatmul.mubr.msk.f32.gmra.mrb[4].mxu0 %vm2337_vm6, %v2117_v23  ;;  %v2152_v17 = vld [vmem:[#allocation4 + $0x38] sm:$0xff]  ;;  %v2129_v42 = vld [vmem:[#allocation3 + $0x88] sm:$0xff]  ;;  %v2130_v43 = vld [vmem:[#allocation3 + $0x90] sm:$0xff] }
 0x48b   : > { %3384 = vmatprep.mubr.msk.f32.mxu0 %vm2337_vm6, %v2118_v24  ;;  %v2169_v44 = vld [vmem:[#allocation4 + $0xc0] sm:$0xff]  ;;  %v2170_v45 = vld [vmem:[#allocation4 + $0xc8] sm:$0xff]  ;;  %v2131_v46 = vld [vmem:[#allocation3 + $0x98] sm:$0xff] }
 0x48c   : > { %2269 = vperm.xlu0 %3703, %v2163_v25   ;;  %2274 = vperm.xlu1 %3704, %v2164_v26   ;;  %v2132_v47 = vld [vmem:[#allocation3 + $0xa0] sm:$0xff]  ;;  %v2154_v49 = vld [vmem:[#allocation4 + $0x48] sm:$0xff]  ;;  %v2134_v11 = vld [vmem:[#allocation3 + $0xb0] sm:$0xff] }
 0x48d   : > { %v2153_v48 = vld [vmem:[#allocation4 + $0x40] sm:$0xff]  ;;  %v2133_v50 = vld [vmem:[#allocation3 + $0xa8] sm:$0xff]  ;;  %v2171_v14 = vld [vmem:[#allocation4 + $0xd0] sm:$0xff] }
 0x48e   : > { %3385 = vmatmul.mubr.msk.f32.gmra.mrb[6].mxu0 %vm2337_vm6, %v2119_v7  ;;  %v2172_v51 = vld [vmem:[#allocation4 + $0xd8] sm:$0xff]  ;;  %v2136_v53 = vld [vmem:[#allocation3 + $0xc0] sm:$0xff]  ;;  %v2155_v54 = vld [vmem:[#allocation4 + $0x50] sm:$0xff] }
 0x48f   : > { %3387 = vmatprep.mubr.msk.f32.mxu0 %vm2337_vm6, %v2120_v10  ;;  %v2135_v52 = vld [vmem:[#allocation3 + $0xb8] sm:$0xff]  ;;  %v2137_v56 = vld [vmem:[#allocation3 + $0xc8] sm:$0xff]  ;;  %v2138_v57 = vld [vmem:[#allocation3 + $0xd0] sm:$0xff] }
 0x490   : > { %2189 = vperm.xlu0 %3703, %v2147_v27   ;;  %2194 = vperm.xlu1 %3704, %v2148_v28   ;;  %v2156_v55 = vld [vmem:[#allocation4 + $0x58] sm:$0xff]  ;;  %v2173_v58 = vld [vmem:[#allocation4 + $0xe0] sm:$0xff]  ;;  %v2174_v13 = vld [vmem:[#allocation4 + $0xe8] sm:$0xff] }
 0x491   : > { %v2139_v16 = vld [vmem:[#allocation3 + $0xd8] sm:$0xff]  ;;  %v2140_v59 = vld [vmem:[#allocation3 + $0xe0] sm:$0xff]  ;;  %v2158_v61 = vld [vmem:[#allocation4 + $0x68] sm:$0xff] }
 0x492   : > { %3388 = vmatmul.mubr.msk.f32.gmra.mrb[8].mxu0 %vm2337_vm6, %v2121_v29  ;;  %v2157_v60 = vld [vmem:[#allocation4 + $0x60] sm:$0xff]  ;;  %v2141_v62 = vld [vmem:[#allocation3 + $0xe8] sm:$0xff]  ;;  %v2142_v63 = vld [vmem:[#allocation3 + $0xf0] sm:$0xff] }
 0x493   : > { %3390 = vmatprep.mubr.msk.f32.mxu0 %vm2337_vm6, %v2122_v30  ;;  %v2175_v0 = vld [vmem:[#allocation4 + $0xf0] sm:$0xff]  ;;  %v2176_v1 = vld [vmem:[#allocation4 + $0xf8] sm:$0xff]  ;;  %v2699_v18 = vld [vmem:[%s4810_s6] sm:$0xff] }
 0x494   : > { %2279 = vperm.xlu0 %3703, %v2165_v31   ;;  %2284 = vperm.xlu1 %3704, %v2166_v32   ;;  %v2143_v2 = vld [vmem:[#allocation3 + $0xf8] sm:$0xff]  ;;  %v2159_v15 = vld [vmem:[#allocation4 + $0x70] sm:$0xff]  ;;  %v2700_v5 = vld [vmem:[%s4810_s6 + $0x8] sm:$0xff] }
 0x495   : > { %v2160_v4 = vld [vmem:[#allocation4 + $0x78] sm:$0xff]  ;;  %v2696_v8 = vld [vmem:[%s4809_s5 + $0x8] sm:$0xff] }
 0x496   : > { %3391 = vmatmul.mubr.msk.f32.gmra.mrb[10].mxu0 %vm2337_vm6, %v2123_v33  ;;  %2775 = vmatprep.mubr.f32.mxu1 %v2696_v8 }
 0x497   : > { %3393 = vmatprep.mubr.msk.f32.mxu0 %vm2337_vm6, %v2124_v34 }
 0x498   : > { %2199 = vperm.xlu0 %3703, %v2149_v35   ;;  %2204 = vperm.xlu1 %3704, %v2150_v36  }
 0x49a   : > { %3394 = vmatmul.mubr.msk.f32.gmra.mrb[12].mxu0 %vm2337_vm6, %v2125_v37 }
 0x49b   : > { %3396 = vmatprep.mubr.msk.f32.mxu0 %vm2337_vm6, %v2126_v38 }
 0x49c   : > { %2289 = vperm.xlu0 %3703, %v2167_v39   ;;  %2294 = vperm.xlu1 %3704, %v2168_v9  }
 0x49e   : > { %3397 = vmatmul.mubr.msk.f32.gmra.mrb[14].mxu0 %vm2337_vm6, %v2127_v40 }
 0x49f   : > { %3399 = vmatprep.mubr.msk.f32.mxu0 %vm2337_vm6, %v2128_v12 }
 0x4a0   : > { %2209 = vperm.xlu0 %3703, %v2151_v41   ;;  %2214 = vperm.xlu1 %3704, %v2152_v17  }
 0x4a2   : > { %3400 = vmatmul.mubr.msk.f32.gmra.mrb[16].mxu0 %vm2337_vm6, %v2129_v42 }
 0x4a3   : > { %3402 = vmatprep.mubr.msk.f32.mxu0 %vm2337_vm6, %v2130_v43 }
 0x4a4   : > { %2299 = vperm.xlu0 %3703, %v2169_v44   ;;  %2304 = vperm.xlu1 %3704, %v2170_v45  }
 0x4a6   : > { %3403 = vmatmul.mubr.msk.f32.gmra.mrb[18].mxu0 %vm2337_vm6, %v2131_v46 }
 0x4a7   : > { %3405 = vmatprep.mubr.msk.f32.mxu0 %vm2337_vm6, %v2132_v47 }
 0x4a8   : > { %2219 = vperm.xlu0 %3703, %v2153_v48   ;;  %2224 = vperm.xlu1 %3704, %v2154_v49  }
 0x4aa   : > { %3406 = vmatmul.mubr.msk.f32.gmra.mrb[20].mxu0 %vm2337_vm6, %v2133_v50 }
 0x4ab   : > { %3408 = vmatprep.mubr.msk.f32.mxu0 %vm2337_vm6, %v2134_v11 }
 0x4ac   : > { %2309 = vperm.xlu0 %3703, %v2171_v14   ;;  %2314 = vperm.xlu1 %3704, %v2172_v51  }
 0x4ae   : > { %3409 = vmatmul.mubr.msk.f32.gmra.mrb[22].mxu0 %vm2337_vm6, %v2135_v52 }
 0x4af   : > { %3411 = vmatprep.mubr.msk.f32.mxu0 %vm2337_vm6, %v2136_v53 }
 0x4b0   : > { %2229 = vperm.xlu0 %3703, %v2155_v54   ;;  %2234 = vperm.xlu1 %3704, %v2156_v55  }
 0x4b2   : > { %3412 = vmatmul.mubr.msk.f32.gmra.mrb[24].mxu0 %vm2337_vm6, %v2137_v56 }
 0x4b3   : > { %3414 = vmatprep.mubr.msk.f32.mxu0 %vm2337_vm6, %v2138_v57 }
 0x4b4   : > { %2319 = vperm.xlu0 %3703, %v2173_v58   ;;  %2324 = vperm.xlu1 %3704, %v2174_v13  }
 0x4b6   : > { %3415 = vmatmul.mubr.msk.f32.gmra.mrb[26].mxu0 %vm2337_vm6, %v2139_v16 }
 0x4b7   : > { %3417 = vmatprep.mubr.msk.f32.mxu0 %vm2337_vm6, %v2140_v59 }
 0x4b8   : > { %2239 = vperm.xlu0 %3703, %v2157_v60   ;;  %2244 = vperm.xlu1 %3704, %v2158_v61  }
 0x4ba   : > { %3418 = vmatmul.mubr.msk.f32.gmra.mrb[28].mxu0 %vm2337_vm6, %v2141_v62 }
 0x4bb   : > { %3420 = vmatprep.mubr.msk.f32.mxu0 %vm2337_vm6, %v2142_v63 }
 0x4bc   : > { %2329 = vperm.xlu0 %3703, %v2175_v0   ;;  %2334 = vperm.xlu1 %3704, %v2176_v1  }
 0x4be   : > { %3421 = vmatmul.mubr.msk.f32.gmra.mrb[30].mxu0 %vm2337_vm6, %v2143_v2 }
 0x4c0   : > { %2249 = vperm.xlu0 %3703, %v2159_v15   ;;  %2254 = vperm.xlu1 %3704, %v2160_v4  }
 0x4c4   : > { %2703 = vperm.xlu0 %3703, %v2699_v18   ;;  %2708 = vperm.xlu1 %3704, %v2700_v5  }
 0x503   : > { %v2180_v6 = vpop.permute.xlu1 %2179  ;;  %v4681_v3 = vpop.permute.xlu0 %2259 }
 0x507   : > { %v2185_v19 = vpop.permute.xlu1 %2184  ;;  %v4686_v20 = vpop.permute.xlu0 %2264 }
 0x50b   : > { %v4688_v21 = vpop.permute.xlu1 %2274  ;;  %v4690_v22 = vpop.permute.xlu0 %2269 }
 0x50f   : > { %v2195_v23 = vpop.permute.xlu1 %2194  ;;  %v2190_v24 = vpop.permute.xlu0 %2189 }
 0x513   : > { %v4692_v25 = vpop.permute.xlu1 %2284  ;;  %v4694_v26 = vpop.permute.xlu0 %2279 }
 0x517   : > { %v2205_v7 = vpop.permute.xlu1 %2204  ;;  %v2200_v10 = vpop.permute.xlu0 %2199 }
 0x51b   : > { %v4696_v27 = vpop.permute.xlu1 %2294  ;;  %v4698_v28 = vpop.permute.xlu0 %2289 }
 0x51f   : > { %v2215_v29 = vpop.permute.xlu1 %2214  ;;  %v2210_v30 = vpop.permute.xlu0 %2209 }
 0x523   : > { %v4700_v31 = vpop.permute.xlu1 %2304  ;;  %v4702_v32 = vpop.permute.xlu0 %2299 }
 0x527   : > { %v2225_v33 = vpop.permute.xlu1 %2224  ;;  %v2220_v34 = vpop.permute.xlu0 %2219 }
 0x52b   : > { %v4704_v35 = vpop.permute.xlu1 %2314  ;;  %v4706_v36 = vpop.permute.xlu0 %2309 }
 0x52f   : > { %v2235_v12 = vpop.permute.xlu1 %2234  ;;  %v2230_v42 = vpop.permute.xlu0 %2229 }
 0x533   : > { %v4710_v14 = vpop.permute.xlu1 %2324  ;;  %v4714_v53 = vpop.permute.xlu0 %2319 }
 0x537   : > { %v2245_v60 = vpop.permute.xlu1 %2244  ;;  %v2240_v63 = vpop.permute.xlu0 %2239 }
 0x555   : > { %v3377_v37 = vpop.f32.mrb[0].mxu0 }
 0x556   : > { %v2510_v38 = vadd.f32 %v3377_v37, %v2185_v19  ;;  %v2504_v39 = vpop.f32.mrb[1].mxu0  ;;  %v4720_v19 = vpop.permute.xlu1 %2334 }
 0x557   : > { %v2505_v9 = vadd.f32 %v2504_v39, %v2180_v6 }
 0x558   : > { %v2664_v40 = vmax.f32 %v2510_v38, 0.0 }
 0x559   : > { %v2663_v41 = vmax.f32 %v2505_v9, 0.0  ;;  %v3380_v17 = vpop.f32.mrb[2].mxu0 }
 0x55a   : > { %v2520_v43 = vadd.f32 %v3380_v17, %v2195_v23  ;;  %v2514_v44 = vpop.f32.mrb[3].mxu0  ;;  %v2255_v9 = vpop.permute.xlu1 %2254 }
 0x55b   : > { %v2515_v45 = vadd.f32 %v2514_v44, %v2190_v24  ;;  %v4708_v46 = vpack.c.bf16 %v2664_v40, %v2663_v41 }
 0x55c   : > { %v2666_v47 = vmax.f32 %v2520_v43, 0.0 }
 0x55d   : > { %v2665_v48 = vmax.f32 %v2515_v45, 0.0  ;;  %v3383_v49 = vpop.f32.mrb[4].mxu0 }
 0x55e   : > { %v2530_v50 = vadd.f32 %v3383_v49, %v2205_v7  ;;  %v2524_v11 = vpop.f32.mrb[5].mxu0  ;;  %v4724_v7 = vpop.permute.xlu0 %2329 }
 0x55f   : > { %v4712_v51 = vpack.c.bf16 %v2666_v47, %v2665_v48  ;;  %v2525_v52 = vadd.f32 %v2524_v11, %v2200_v10 }
 0x560   : > { %v2668_v54 = vmax.f32 %v2530_v50, 0.0 }
 0x561   : > { %v2667_v55 = vmax.f32 %v2525_v52, 0.0  ;;  %v3386_v56 = vpop.f32.mrb[6].mxu0 }
 0x562   : > { %v2540_v57 = vadd.f32 %v3386_v56, %v2215_v29  ;;  %v2534_v58 = vpop.f32.mrb[7].mxu0  ;;  %v2250_v41 = vpop.permute.xlu0 %2249 }
 0x563   : > { %v4716_v13 = vpack.c.bf16 %v2668_v54, %v2667_v55  ;;  %v2535_v16 = vadd.f32 %v2534_v58, %v2210_v30 }
 0x564   : > { %v2670_v59 = vmax.f32 %v2540_v57, 0.0 }
 0x565   : > { %v2669_v61 = vmax.f32 %v2535_v16, 0.0  ;;  %v3389_v62 = vpop.f32.mrb[8].mxu0 }
 0x566   : > { %v2550_v0 = vadd.f32 %v3389_v62, %v2225_v33  ;;  %v2544_v1 = vpop.f32.mrb[9].mxu0 }
 0x567   : > { %v4718_v2 = vpack.c.bf16 %v2670_v59, %v2669_v61  ;;  %v2545_v15 = vadd.f32 %v2544_v1, %v2220_v34 }
 0x568   : > { %v2672_v4 = vmax.f32 %v2550_v0, 0.0 }
 0x569   : > { %v2671_v18 = vmax.f32 %v2545_v15, 0.0  ;;  %v3392_v5 = vpop.f32.mrb[10].mxu0 }
 0x56a   : > { %v2560_v6 = vadd.f32 %v3392_v5, %v2235_v12  ;;  %v2554_v8 = vpop.f32.mrb[11].mxu0 }
 0x56b   : > { %v4722_v23 = vpack.c.bf16 %v2672_v4, %v2671_v18  ;;  %v2555_v24 = vadd.f32 %v2554_v8, %v2230_v42 }
 0x56c   : > { %v2674_v10 = vmax.f32 %v2560_v6, 0.0 }
 0x56d   : > { %v2673_v29 = vmax.f32 %v2555_v24, 0.0  ;;  %v3395_v30 = vpop.f32.mrb[12].mxu0 }
 0x56e   : > { %v2570_v33 = vadd.f32 %v3395_v30, %v2245_v60  ;;  %v2564_v37 = vpop.f32.mrb[13].mxu0 }
 0x56f   : > { %v4726_v38 = vpack.c.bf16 %v2674_v10, %v2673_v29  ;;  %v2565_v34 = vadd.f32 %v2564_v37, %v2240_v63 }
 0x570   : > { %v2676_v39 = vmax.f32 %v2570_v33, 0.0 }
 0x571   : > { %v2675_v40 = vmax.f32 %v2565_v34, 0.0  ;;  %v3398_v12 = vpop.f32.mrb[14].mxu0 }
 0x572   : > { %v2580_v17 = vadd.f32 %v3398_v12, %v2255_v9  ;;  %v2574_v43 = vpop.f32.mrb[15].mxu0 }
 0x573   : > { %v4728_v44 = vpack.c.bf16 %v2676_v39, %v2675_v40  ;;  %v2575_v42 = vadd.f32 %v2574_v43, %v2250_v41 }
 0x574   : > { %v2678_v45 = vmax.f32 %v2580_v17, 0.0 }
 0x575   : > { %v2677_v47 = vmax.f32 %v2575_v42, 0.0  ;;  %v3401_v48 = vpop.f32.mrb[16].mxu0 }
 0x576   : > { %v2590_v49 = vadd.f32 %v3401_v48, %v4686_v20  ;;  %v2584_v50 = vpop.f32.mrb[17].mxu0 }
 0x577   : > { %v4731_v11 = vpack.c.bf16 %v2678_v45, %v2677_v47  ;;  %v2585_v52 = vadd.f32 %v2584_v50, %v4681_v3  ;;  %v2704_v47 = vpop.permute.xlu0 %2703 }
 0x578   : > { %v2680_v54 = vmax.f32 %v2590_v49, 0.0 }
 0x579   : > { %v2679_v55 = vmax.f32 %v2585_v52, 0.0  ;;  %v3404_v56 = vpop.f32.mrb[18].mxu0 }
 0x57a   : > { %v2600_v57 = vadd.f32 %v3404_v56, %v4688_v21  ;;  %v2594_v58 = vpop.f32.mrb[19].mxu0 }
 0x57b   : > { %v2595_v16 = vadd.f32 %v2594_v58, %v4690_v22  ;;  %v3459_v59 = vpack.c.bf16 %v2680_v54, %v2679_v55  ;;  %v2709_v54 = vpop.permute.xlu1 %2708 }
 0x57c   : > { %v2682_v60 = vmax.f32 %v2600_v57, 0.0 }
 0x57d   : > { %v2681_v61 = vmax.f32 %v2595_v16, 0.0  ;;  %v3407_v62 = vpop.f32.mrb[20].mxu0  ;;  %3460 = vmatprep.subr.bf16.mxu1 %v3459_v59 }
 0x57e   : > { %v2610_v20 = vadd.f32 %v3407_v62, %v4692_v25  ;;  %v2604_v63 = vpop.f32.mrb[21].mxu0  ;;  %3462 = vmatpush3.bf16.msra.mxu1 %v4708_v46 }
 0x57f   : > { %v3463_v0 = vpack.c.bf16 %v2682_v60, %v2681_v61  ;;  %v2605_v3 = vadd.f32 %v2604_v63, %v4694_v26 }
 0x580   : > { %v2684_v1 = vmax.f32 %v2610_v20, 0.0 }
 0x581   : > { %v2683_v15 = vmax.f32 %v2605_v3, 0.0  ;;  %v3410_v4 = vpop.f32.mrb[22].mxu0  ;;  %3464 = vmatprep.subr.bf16.mxu1 %v3463_v0 }
 0x582   : > { %v2620_v21 = vadd.f32 %v3410_v4, %v4696_v27  ;;  %v2614_v22 = vpop.f32.mrb[23].mxu0  ;;  %3466 = vmatpush3.bf16.msra.mxu1 %v4712_v51 }
 0x583   : > { %v3467_v18 = vpack.c.bf16 %v2684_v1, %v2683_v15  ;;  %v2615_v5 = vadd.f32 %v2614_v22, %v4698_v28 }
 0x584   : > { %v2686_v6 = vmax.f32 %v2620_v21, 0.0 }
 0x585   : > { %v2685_v25 = vmax.f32 %v2615_v5, 0.0  ;;  %v3413_v8 = vpop.f32.mrb[24].mxu0  ;;  %3468 = vmatprep.subr.bf16.mxu1 %v3467_v18 }
 0x586   : > { %v2630_v46 = vadd.f32 %v3413_v8, %v4700_v31  ;;  %v2624_v24 = vpop.f32.mrb[25].mxu0  ;;  %3470 = vmatpush3.bf16.msra.mxu1 %v4716_v13 }
 0x587   : > { %v3471_v26 = vpack.c.bf16 %v2686_v6, %v2685_v25  ;;  %v2625_v10 = vadd.f32 %v2624_v24, %v4702_v32 }
 0x588   : > { %v2688_v29 = vmax.f32 %v2630_v46, 0.0 }
 0x589   : > { %v2687_v27 = vmax.f32 %v2625_v10, 0.0  ;;  %v3416_v30 = vpop.f32.mrb[26].mxu0  ;;  %3472 = vmatprep.subr.bf16.mxu1 %v3471_v26 }
 0x58a   : > { %v2640_v51 = vadd.f32 %v3416_v30, %v4704_v35  ;;  %v2634_v33 = vpop.f32.mrb[27].mxu0  ;;  %3474 = vmatpush3.bf16.msra.mxu1 %v4718_v2 }
 0x58b   : > { %v3475_v28 = vpack.c.bf16 %v2688_v29, %v2687_v27  ;;  %v2635_v37 = vadd.f32 %v2634_v33, %v4706_v36 }
 0x58c   : > { %v2690_v34 = vmax.f32 %v2640_v51, 0.0 }
 0x58d   : > { %v2689_v31 = vmax.f32 %v2635_v37, 0.0  ;;  %v3419_v39 = vpop.f32.mrb[28].mxu0  ;;  %3476 = vmatprep.subr.bf16.mxu1 %v3475_v28 }
 0x58e   : > { %v2650_v13 = vadd.f32 %v3419_v39, %v4710_v14  ;;  %v2644_v9 = vpop.f32.mrb[29].mxu0  ;;  %3478 = vmatpush3.bf16.msra.mxu1 %v4722_v23 }
 0x58f   : > { %v3479_v32 = vpack.c.bf16 %v2690_v34, %v2689_v31  ;;  %v2645_v40 = vadd.f32 %v2644_v9, %v4714_v53  ;;  %v2695_v53 = vld [vmem:[%s4809_s5] sm:$0xff] }
 0x590   : > { %v2692_v12 = vmax.f32 %v2650_v13, 0.0 }
 0x591   : > { %v2691_v35 = vmax.f32 %v2645_v40, 0.0  ;;  %v3422_v41 = vpop.f32.mrb[30].mxu0  ;;  %3480 = vmatprep.subr.bf16.mxu1 %v3479_v32 }
 0x592   : > { %v2660_v2 = vadd.f32 %v3422_v41, %v4720_v19  ;;  %v2654_v17 = vpop.f32.mrb[31].mxu0  ;;  %3482 = vmatpush3.bf16.msra.mxu1 %v4726_v38  ;;  %v2698_v19 = vld [vmem:[%s4809_s5 + $0x18] sm:$0xff] }
 0x593   : > { %v3483_v36 = vpack.c.bf16 %v2692_v12, %v2691_v35  ;;  %v2655_v43 = vadd.f32 %v2654_v17, %v4724_v7  ;;  %v2697_v7 = vld [vmem:[%s4809_s5 + $0x10] sm:$0xff] }
 0x594   : > { %v2694_v42 = vmax.f32 %v2660_v2, 0.0 }
 0x595   : > { %v2693_v14 = vmax.f32 %v2655_v43, 0.0  ;;  %3484 = vmatprep.subr.bf16.mxu1 %v3483_v36 }
 0x596   : > { %3486 = vmatpush3.bf16.msra.mxu1 %v4728_v44 }
 0x597   : > { %v3487_v23 = vpack.c.bf16 %v2694_v42, %v2693_v14 }
 0x599   : > { %3488 = vmatprep.subr.bf16.mxu1 %v3487_v23 }
 0x59a   : > { %3490 = vmatpush3.bf16.msra.mxu1 %v4731_v11 }
 0x59d   : > { %2776 = vmatmul.mubr.f32.vlgmr.msra.gmra.mrb[0].mxu1 %v2695_v53 }
 0x59e   : > { %2780 = vmatprep.mubr.f32.mxu1 %v2698_v19 }
 0x5a1   : > { %2781 = vmatmul.mubr.f32.gmra.mrb[2].mxu1 %v2697_v7 }
 0x670   : > { %v3265_v38 = vpop.f32.mrb[0].mxu1 }
 0x671   : > { %v3266_v44 = vpop.f32.mrb[1].mxu1 }
 0x672   : > { %v3267_v45 = vadd.f32 %v3266_v44, %v3265_v38 }
 0x674   : > { %v2778_v48 = vadd.f32 %v3267_v45, %v2704_v47  ;;  %v3268_v49 = vpop.f32.mrb[2].mxu1 }
 0x675   : > { %v3269_v50 = vpop.f32.mrb[3].mxu1 }
 0x676   : > { %v2792_v11 = vand.u32 2147483647, %v2778_v48  ;;  %v3270_v52 = vadd.f32 %v3269_v50, %v3268_v49  ;;  %v2786_v18 = vmax.f32 %v2778_v48, 0.0  ;;  %vm2788_vm8 = vcmp.ne.f32.partialorder %v2778_v48, %v2778_v48 }
 0x678   : > { %v2794_v55 = vsub.f32 0.0, %v2792_v11  ;;  %v2783_v56 = vadd.f32 %v3270_v52, %v2709_v54 }
 0x67a   : > { %v2796_v57 = vmul.f32 1.442695, %v2794_v55  ;;  %v2793_v58 = vand.u32 2147483647, %v2783_v56  ;;  %v2787_v10 = vmax.f32 %v2783_v56, 0.0  ;;  %vm2789_vm10 = vcmp.ne.f32.partialorder %v2783_v56, %v2783_v56 }
 0x67c   : > { %3705 = vpow2.f32 %v2796_v57  ;;  %v2795_v16 = vsub.f32 0.0, %v2793_v58 }
 0x67e   : > { %v2798_v59 = vmul.f32 1.442695, %v2795_v16 }
 0x680   : > { %3707 = vpow2.f32 %v2798_v59 }
 0x686   : > { %v3706_v60 = vpop.eup %3705 }
 0x687   : > { %v2800_v61 = vadd.f32 1.0, %v3706_v60  ;;  %v2803_v63 = vmul.f32 -0.5, %v3706_v60  ;;  %v2806_v1 = vand.u32 2147483647, %v3706_v60 }
 0x689   : > { %3709 = vlog2.f32 %v2800_v61  ;;  %v2804_v0 = vadd.f32 1.0, %v2803_v63  ;;  %vm2807_vm7 = vcmp.lt.f32.partialorder %v2806_v1, 0.0004427343 }
 0x68a   : > { %v3708_v62 = vpop.eup %3707 }
 0x68b   : > { %v2809_v20 = vadd.f32 1.0, %v3708_v62  ;;  %v2812_v3 = vmul.f32 -0.5, %v3708_v62  ;;  %v2805_v21 = vmul.f32 %v3706_v60, %v2804_v0  ;;  %v2815_v5 = vand.u32 2147483647, %v3708_v62 }
 0x68d   : > { %3711 = vlog2.f32 %v2809_v20  ;;  %v2813_v22 = vadd.f32 1.0, %v2812_v3  ;;  %vm2816_vm9 = vcmp.lt.f32.partialorder %v2815_v5, 0.0004427343 }
 0x68f   : > { %v2814_v24 = vmul.f32 %v3708_v62, %v2813_v22 }
 0x693   : > { %v3710_v15 = vpop.eup %3709 }
 0x694   : > { %v2802_v4 = vmul.f32 0.6931472, %v3710_v15 }
 0x696   : > { %v2808_v6 = vsel %vm2807_vm7, %v2805_v21, %v2802_v4 }
 0x697   : > { %v3712_v25 = vpop.eup %3711  ;;  %v2818_v8 = vadd.f32 %v2808_v6, %v2786_v18 }
 0x698   : > { %v2811_v46 = vmul.f32 0.6931472, %v3712_v25 }
 0x699   : > { %v2820_v26 = vsel %vm2788_vm8, %v2778_v48, %v2818_v8 }
 0x69a   : > { %2822 = vst [vmem:[%s3914_s20] sm:$0xff] %v2820_v26  ;;  %v2817_v29 = vsel %vm2816_vm9, %v2814_v24, %v2811_v46 }
 0x69b   : > { %v2819_v27 = vadd.f32 %v2817_v29, %v2787_v10 }
 0x69d   : > { %v2821_v30 = vsel %vm2789_vm10, %v2783_v56, %v2819_v27 }
 0x69e   : > { %2823 = vst [vmem:[%s3914_s20 + $0x8] sm:$0xff] %v2821_v30 }
 0x69f PF: > { %2830 = sbr.rel (!%p3892_p6) target bundleno = 1703 (0x6a7), region = 68  ;;  %s3091_s18 = sshll.u32 (%p3892_p6), %s3767_s28, 2 }
 0x6a0   : > { %s2831_s17 = smul.u32 (%p3892_p6), %s3759_s26, %s3763_s27 }
 0x6a1   : > { %v2865_v51 = vld [vmem:[%s3914_s20] sm:$0xff] (%p3892_p6) }
 0x6a2   : > { %s2833_s24 = sadd.s32 (%p3892_p6), %s3091_s18, %s2831_s17 }
 0x6a3   : > { %s3092_s11 = sshll.u32 (%p3892_p6), %s2833_s24, 3 }
 0x6a4   : > { %s2835_s23 = scalar_lea.vmem (%p3892_p6), %s4811_s7, %s3092_s11 }
 0x6a5   : > { %v2867_v33 = vld [vmem:[%s3914_s20 + $0x8] sm:$0xff] (%p3892_p6)  ;;  %2866 = vst [vmem:[%s2835_s23] sm:$0xff] (%p3892_p6), %v2865_v51 }
 0x6a6   : > { %2868 = vst [vmem:[%s2835_s23 + $0x10] sm:$0xff] %v2867_v33 }
 0x6a7 PF: > { %s17_s9 = sadd.s32 1, %s3783_s9   ;;  %s4817_s16 = sld [smem:[#allocation6_spill]] }
 0x6a8   : > { %p14_p2 = scmp.ge.s32.totalorder %s17_s9, 10   ;;  %s4818_s20 = sld [smem:[#allocation7_spill]] }
 0x6a9   : > { %s4819_s24 = smov %s3755_s25  ;;  %s4820_s25 = smov %s3902_s21 }
 0x6aa   : > { %s4821_s26 = smov %s3771_s29  ;;  %s4822_s27 = smov %s3775_s30 }
 0x6ab   : > { %s4823_s28 = smov %s3779_s8  ;;  %s4824_s29 = smov %s4828_s10 }
 0x6ac   :  { %16 = sbr.rel (!%p14_p2) target bundleno = 5 (0x5), region = 132 }
 0x6ad   : > { %s4825_s30 = smov %s4817_s16 }
 0x6ae   : > { %s4826_s8 = smov %s4818_s20 }

</bundles_post_ra>
